<compile_context>
chip_gen: v7x
topology: tpu7x:2x2x1
jax: 0.10.0
libtpu: 0.0.40
codegen_flags: <defaults>
</compile_context>

<pallas_src>
import math

import jax
import jax.numpy as jnp
from jax.experimental import pallas as pl
from jax.experimental.pallas import tpu as pltpu

# GrammarVAE(50, 50, 50, NCHARS, 'gru') with the equation grammar:
NCHARS = 12            # production rules = conv in-channels = logits dim
MAX_LEN = 15           # Linear(36, hidden) in the encoder implies input length 15
HIDDEN_ENC = 50
Z_DIM = 50
HIDDEN_DEC = 50
C1, K1 = 2, 2          # Conv1d(NCHARS, 2, kernel_size=2)
C2, K2 = 3, 3          # Conv1d(2, 3, kernel_size=3)
C3, K3 = 4, 4          # Conv1d(3, 4, kernel_size=4)
L1 = MAX_LEN - K1 + 1  # 14
L2 = L1 - K2 + 1       # 12
L3 = L2 - K3 + 1       # 9
FLAT = C3 * L3         # 36

# Lane-friendly packing constants.
HP = 64                # per-gate lane pad: gates at lane offsets 0 / 64 / 128
GW = 3 * HP            # 192 packed gate width (single 256-wide MXU N-pass on v6e/v7x)
OUT_PAD = 128          # lane-padded logits width -> full-lane stores (helps v5e most)

# Window-arithmetic invariants for the batched row-slab convolutions: every
# *valid* output row's receptive field must stay inside its own sample's
# MAX_LEN-row block, otherwise the "garbage rows are never read" argument
# silently breaks when a kernel size changes.
assert L1 > 0 and L2 > 0 and L3 > 0
assert FLAT == C3 * L3
assert (L3 - 1) + (K3 - 1) + (K2 - 1) + (K1 - 1) <= MAX_LEN - 1

_VMEM = pl.BlockSpec(memory_space=pltpu.MemorySpace.VMEM)


def _conv_relu_slab(h, w, b, k, ci):
    """Batched 'valid' 1-D conv along the row axis of a (rows, ci) slab.

    All k kernel taps are fused into ONE matmul: the k row-shifted views of the
    slab are lane-concatenated into a (rows-k+1, k*ci) tile and hit the MXU once
    (the shift/concat copies land on the XLU slot, which has slack here).
    Operands are bf16 (single MXU pass), accumulation is f32.  Rows whose window
    straddles a batch boundary hold garbage but are never consumed when
    producing later layers' *valid* rows (see asserts above).
    """
    n_out = h.shape[0] - (k - 1)
    hb = h.astype(jnp.bfloat16)
    taps = jnp.concatenate([hb[kk:kk + n_out, :] for kk in range(k)], axis=1)
    acc = jnp.dot(taps, w.astype(jnp.bfloat16), preferred_element_type=jnp.float32)
    return jnp.maximum(acc + b, 0.0)


# ----------------------------------------------------------------------------
# Fused encoder + reparameterization + decoder kernel.
# ----------------------------------------------------------------------------
def _vae_kernel(x_ref,
                w1_ref, b1_ref, w2_ref, b2_ref, w3_ref, b3_ref,
                wl_ref, bl_ref, wms_ref, bms_ref,
                eps_ref,
                win_ref, bin_ref, wi_ref, bi_ref, wh_ref, bh_ref,
                wout_ref, bout_ref,
                logits_ref, kl_ref,
                hs_ref):
    batch = eps_ref.shape[0]

    # -------- encoder: conv stack, batched over B via the row slab -----------
    x = x_ref[...]                                                # (B*MAX_LEN, NCHARS)
    h1 = _conv_relu_slab(x, w1_ref[...], b1_ref[...], K1, NCHARS)    # valid l < 14
    h2 = _conv_relu_slab(h1, w2_ref[...], b2_ref[...], K2, C1)       # valid l < 12
    h3 = _conv_relu_slab(h2, w3_ref[...], b3_ref[...], K3, C2)       # valid l < 9

    # flatten + Linear(36,50) + ReLU: one lane-concat of the L3 shifted views
    # gives length-major [l, c] window rows; only row b*MAX_LEN per sample is a
    # full valid window, so the Linear runs on just those B rows (one matmul).
    n4 = h3.shape[0] - (L3 - 1)
    h3b = h3.astype(jnp.bfloat16)
    taps4 = jnp.concatenate([h3b[kk:kk + n4, :] for kk in range(L3)], axis=1)
    henc_in = jnp.concatenate(
        [taps4[b * MAX_LEN:b * MAX_LEN + 1, :] for b in range(batch)], axis=0)
    henc = jnp.maximum(
        jnp.dot(henc_in, wl_ref[...].astype(jnp.bfloat16),
                preferred_element_type=jnp.float32) + bl_ref[...], 0.0)   # (B, 50)

    # -------- mu / sigma heads (packed, f32) + KL -----------------------------
    ms = jnp.dot(henc, wms_ref[...], preferred_element_type=jnp.float32) + bms_ref[...]
    mu = ms[:, :Z_DIM]
    sigma = jax.nn.softplus(ms[:, Z_DIM:2 * Z_DIM])
    # Matches the reference: kl = -0.5 * sum(1 + log(sigma) - mu^2 - sigma),
    # summed over batch and latent dim.  (log(softplus(.)) can underflow for
    # extremely negative pre-activations; kept exact to preserve semantics.)
    kl_ref[...] = -0.5 * jnp.sum(1.0 + jnp.log(sigma) - mu * mu - sigma,
                                 keepdims=True)

    # -------- reparameterized sample + decoder input --------------------------
    z = mu + eps_ref[...] * jnp.sqrt(sigma)                        # (B, Z)
    x_in = jnp.maximum(
        jnp.dot(z, win_ref[...], preferred_element_type=jnp.float32) + bin_ref[...],
        0.0)                                                       # (B, 50)

    # -------- GRU recurrence ---------------------------------------------------
    # Gates packed [r | z | n] at lane offsets 0 / HP / 2*HP so no per-step gate
    # slice straddles a 128-lane vreg tile.  The GRU input is identical every
    # timestep -> one fused input-gate matmul outside the loop.  Matmul operands
    # are bf16 (single MXU pass); accumulation & elementwise math stay f32.
    # Padded columns [50:64) of h stay exactly 0 through the recurrence.
    gi = jnp.dot(x_in.astype(jnp.bfloat16), wi_ref[...].astype(jnp.bfloat16),
                 preferred_element_type=jnp.float32) + bi_ref[...]     # (B, 192)
    gi_rz = gi[:, :2 * HP]
    gi_n = gi[:, 2 * HP:]
    wh = wh_ref[...].astype(jnp.bfloat16)                              # (64, 192)
    bh = jnp.broadcast_to(bh_ref[...], (batch, GW))                    # hoisted

    h = jnp.zeros((batch, HP), jnp.float32)
    for t in range(MAX_LEN):   # static unroll of the 15-step serial recurrence
        gh = jnp.dot(h.astype(jnp.bfloat16), wh,
                     preferred_element_type=jnp.float32) + bh          # (B, 192)
        s = jax.nn.sigmoid(gi_rz + gh[:, :2 * HP])
        r = s[:, :HP]
        u = s[:, HP:2 * HP]
        n = jnp.tanh(gi_n + r * gh[:, 2 * HP:])
        h = (1.0 - u) * n + u * h
        # relu(h_t) feeds only the (hoisted) output projection; write it to the
        # VMEM slab (time-major rows) to bound the vreg live range.
        hs_ref[t * batch:(t + 1) * batch, :] = jnp.maximum(h, 0.0)

    # -------- output projection: ONE matmul + ONE full-lane store -------------
    hslab = hs_ref[...]                                                # (B*ML, 64)
    logits_ref[...] = (jnp.dot(hslab, wout_ref[...],
                               preferred_element_type=jnp.float32) + bout_ref[...])


# ----------------------------------------------------------------------------
# Wrappers
# ----------------------------------------------------------------------------
def _vae_pallas_call(x2d, eps, p, batch):
    n_rows = batch * MAX_LEN
    enc_params = (p['enc_w1'], p['enc_b1'], p['enc_w2'], p['enc_b2'],
                  p['enc_w3'], p['enc_b3'], p['enc_wl'], p['enc_bl'],
                  p['enc_wms'], p['enc_bms'])
    dec_params = (p['dec_win'], p['dec_bin'], p['dec_wi'], p['dec_bi'],
                  p['dec_wh'], p['dec_bh'], p['dec_wout'], p['dec_bout'])

    # Advisory cost estimate: helps XLA schedule the tiny surrounding ops
    # (input transpose, eps generation) against this latency-bound custom call.
    flops = (2 * n_rows * (K1 * NCHARS * C1 + K2 * C1 * C2 + K3 * C2 * C3)
             + 2 * batch * (FLAT * HIDDEN_ENC + HIDDEN_ENC * 2 * Z_DIM
                            + Z_DIM * HIDDEN_DEC + HIDDEN_DEC * GW)
             + 2 * MAX_LEN * batch * HP * GW
             + 2 * n_rows * HP * OUT_PAD)
    transcendentals = batch * (MAX_LEN * GW + 6 * Z_DIM)
    bytes_accessed = 4 * (int(x2d.size) + int(eps.size)
                          + sum(int(v.size) for v in enc_params + dec_params)
                          + n_rows * OUT_PAD + 1)

    return pl.pallas_call(
        _vae_kernel,
        out_shape=(jax.ShapeDtypeStruct((n_rows, OUT_PAD), jnp.float32),
                   jax.ShapeDtypeStruct((1, 1), jnp.float32)),
        in_specs=[_VMEM] * 20,
        out_specs=(_VMEM, _VMEM),
        scratch_shapes=[pltpu.VMEM((n_rows, HP), jnp.float32)],
        cost_estimate=pl.CostEstimate(flops=flops,
                                      transcendentals=transcendentals,
                                      bytes_accessed=bytes_accessed),
    )(x2d, *enc_params, eps, *dec_params)


@jax.jit
def grammar_vae_training_forward(x_ncl, p, eps_key):
    """x_ncl: (B, NCHARS, MAX_LEN) float32 (PyTorch Conv1d NCL layout)."""
    b = x_ncl.shape[0]
    # Channels-last row slab (B*MAX_LEN, NCHARS); tiny and fuses under jit.
    x2d = jnp.transpose(x_ncl, (0, 2, 1)).astype(jnp.float32).reshape(b * MAX_LEN, NCHARS)
    eps = jax.random.normal(eps_key, (b, Z_DIM), jnp.float32)   # eps ~ N(0, I)
    logits_tm, kl = _vae_pallas_call(x2d, eps, p, b)
    # Kernel emits a time-major, lane-padded (MAX_LEN*B, 128) slab; the reshape,
    # transpose and lane-slice below touch ~1.5 KiB and are free under jit.
    logits = jnp.transpose(
        logits_tm.reshape(MAX_LEN, b, OUT_PAD), (1, 0, 2))[:, :, :NCHARS]
    return logits, kl[0, 0]


# ----------------------------------------------------------------------------
# Deterministic parameter init (PyTorch-convention shapes -> kernel layouts)
# ----------------------------------------------------------------------------
def _uniform(key, shape, bound):
    return jax.random.uniform(key, shape, jnp.float32, -bound, bound)


def init_params(key):
    ks = list(jax.random.split(key, 24))
    nk = lambda: ks.pop()

    def conv_wb(ci, co, k):
        bound = 1.0 / math.sqrt(ci * k)
        return _uniform(nk(), (co, ci, k), bound), _uniform(nk(), (co,), bound)

    def lin_wb(fin, fout):
        bound = 1.0 / math.sqrt(fin)
        return _uniform(nk(), (fout, fin), bound), _uniform(nk(), (fout,), bound)

    # PyTorch-convention parameters
    w1, b1 = conv_wb(NCHARS, C1, K1)
    w2, b2 = conv_wb(C1, C2, K2)
    w3, b3 = conv_wb(C2, C3, K3)
    wl, bl = lin_wb(FLAT, HIDDEN_ENC)
    wmu, bmu = lin_wb(HIDDEN_ENC, Z_DIM)
    wsig, bsig = lin_wb(HIDDEN_ENC, Z_DIM)
    win, b_in = lin_wb(Z_DIM, HIDDEN_DEC)
    gbound = 1.0 / math.sqrt(HIDDEN_DEC)
    wih = _uniform(nk(), (3 * HIDDEN_DEC, HIDDEN_DEC), gbound)  # gate rows [r, z, n]
    whh = _uniform(nk(), (3 * HIDDEN_DEC, HIDDEN_DEC), gbound)
    bih = _uniform(nk(), (3 * HIDDEN_DEC,), gbound)
    bhh = _uniform(nk(), (3 * HIDDEN_DEC,), gbound)
    wout, bout = lin_wb(HIDDEN_DEC, NCHARS)

    def conv_to_kernel(w, b):
        co, ci, k = w.shape
        # rows ordered [tap, in_ch] to match the kernel's lane-concat of taps
        return (jnp.transpose(w, (2, 1, 0)).reshape(k * ci, co), b.reshape(1, co))

    H = HIDDEN_DEC

    def pack_gate_w(w, in_dim, in_pad):
        # PyTorch (3H, in_dim) gate rows [r|z|n] -> (in_pad, 192) with gates at
        # lane offsets 0/64/128; padded rows/columns are zero.
        out = jnp.zeros((in_pad, 3 * HP), jnp.float32)
        for g in range(3):
            out = out.at[:in_dim, g * HP:g * HP + H].set(w[g * H:(g + 1) * H, :].T)
        return out

    def pack_gate_b(bv):
        out = jnp.zeros((1, 3 * HP), jnp.float32)
        for g in range(3):
            out = out.at[0, g * HP:g * HP + H].set(bv[g * H:(g + 1) * H])
        return out

    p = {}
    p['enc_w1'], p['enc_b1'] = conv_to_kernel(w1, b1)
    p['enc_w2'], p['enc_b2'] = conv_to_kernel(w2, b2)
    p['enc_w3'], p['enc_b3'] = conv_to_kernel(w3, b3)
    # Linear(36,50): permute columns from PyTorch's channel-major flatten of
    # (C3, L3) to the kernel's length-major [l, c] window columns.
    p['enc_wl'] = jnp.transpose(wl.reshape(HIDDEN_ENC, C3, L3), (2, 1, 0)).reshape(FLAT, HIDDEN_ENC)
    p['enc_bl'] = bl.reshape(1, HIDDEN_ENC)
    # mu / sigma heads packed column-wise: [W_mu^T | W_sigma^T]
    p['enc_wms'] = jnp.concatenate([wmu.T, wsig.T], axis=1)          # (50, 100)
    p['enc_bms'] = jnp.concatenate([bmu, bsig]).reshape(1, 2 * Z_DIM)

    p['dec_win'], p['dec_bin'] = win.T, b_in.reshape(1, H)
    p['dec_wi'] = pack_gate_w(wih, H, H)            # (50, 192)
    p['dec_bi'] = pack_gate_b(bih)                  # (1, 192)
    p['dec_wh'] = pack_gate_w(whh, H, HP)           # (64, 192), rows 50:64 zero
    p['dec_bh'] = pack_gate_b(bhh)                  # (1, 192)
    # output head lane-padded to 128 columns / 64 rows (padded entries zero)
    p['dec_wout'] = jnp.zeros((HP, OUT_PAD), jnp.float32).at[:H, :NCHARS].set(wout.T)
    p['dec_bout'] = jnp.zeros((1, OUT_PAD), jnp.float32).at[0, :NCHARS].set(bout)
    return p


if __name__ == "__main__":
    key = jax.random.PRNGKey(0)
    k_param, k_data, k_eps = jax.random.split(key, 3)

    params = init_params(k_param)

    B = 2
    # one-hot production-rule sequences, PyTorch Conv1d layout (B, NCHARS, MAX_LEN)
    idx = jax.random.randint(k_data, (B, MAX_LEN), 0, NCHARS)
    x = jnp.transpose(jax.nn.one_hot(idx, NCHARS, dtype=jnp.float32), (0, 2, 1))

    logits, kl_loss = grammar_vae_training_forward(x, params, k_eps)
    (logits, kl_loss) = jax.block_until_ready((logits, kl_loss))

    assert logits.shape == (B, MAX_LEN, NCHARS), logits.shape
    assert kl_loss.shape == (), kl_loss.shape
    assert bool(jnp.all(jnp.isfinite(logits))) and bool(jnp.isfinite(kl_loss))
    print("KERNEL_OK")
</pallas_src>

<mosaic_0001>
module attributes {stable_mosaic.version = 11 : i64} {
  func.func @_vae_kernel(%arg0: memref<30x12xf32, #tpu.memory_space<vmem>>, %arg1: memref<24x2xf32, #tpu.memory_space<vmem>>, %arg2: memref<1x2xf32, #tpu.memory_space<vmem>>, %arg3: memref<6x3xf32, #tpu.memory_space<vmem>>, %arg4: memref<1x3xf32, #tpu.memory_space<vmem>>, %arg5: memref<12x4xf32, #tpu.memory_space<vmem>>, %arg6: memref<1x4xf32, #tpu.memory_space<vmem>>, %arg7: memref<36x50xf32, #tpu.memory_space<vmem>>, %arg8: memref<1x50xf32, #tpu.memory_space<vmem>>, %arg9: memref<50x100xf32, #tpu.memory_space<vmem>>, %arg10: memref<1x100xf32, #tpu.memory_space<vmem>>, %arg11: memref<2x50xf32, #tpu.memory_space<vmem>>, %arg12: memref<50x50xf32, #tpu.memory_space<vmem>>, %arg13: memref<1x50xf32, #tpu.memory_space<vmem>>, %arg14: memref<50x192xf32, #tpu.memory_space<vmem>>, %arg15: memref<1x192xf32, #tpu.memory_space<vmem>>, %arg16: memref<64x192xf32, #tpu.memory_space<vmem>>, %arg17: memref<1x192xf32, #tpu.memory_space<vmem>>, %arg18: memref<64x128xf32, #tpu.memory_space<vmem>>, %arg19: memref<1x128xf32, #tpu.memory_space<vmem>>, %arg20: memref<30x128xf32, #tpu.memory_space<vmem>>, %arg21: memref<1x1xf32, #tpu.memory_space<vmem>>, %arg22: memref<30x64xf32, #tpu.memory_space<vmem>>) attributes {dimension_semantics = [], scalar_prefetch = 0 : i64, scratch_operands = 1 : i64, tpu.core_type = #tpu.core_type<tc>} {
    %c0 = arith.constant 0 : index
    %c0_0 = arith.constant 0 : index
    %0 = vector.load %arg0[%c0, %c0_0] : memref<30x12xf32, #tpu.memory_space<vmem>>, vector<30x12xf32>
    %c0_1 = arith.constant 0 : index
    %c0_2 = arith.constant 0 : index
    %1 = vector.load %arg1[%c0_1, %c0_2] : memref<24x2xf32, #tpu.memory_space<vmem>>, vector<24x2xf32>
    %c0_3 = arith.constant 0 : index
    %c0_4 = arith.constant 0 : index
    %2 = vector.load %arg2[%c0_3, %c0_4] : memref<1x2xf32, #tpu.memory_space<vmem>>, vector<1x2xf32>
    %3 = arith.truncf %0 : vector<30x12xf32> to vector<30x12xbf16>
    %4 = vector.extract_strided_slice %3 {offsets = [0, 0], sizes = [29, 12], strides = [1, 1]} : vector<30x12xbf16> to vector<29x12xbf16>
    %5 = vector.extract_strided_slice %3 {offsets = [1, 0], sizes = [29, 12], strides = [1, 1]} : vector<30x12xbf16> to vector<29x12xbf16>
    %6 = tpu.concatenate %4, %5 in 1 : vector<29x12xbf16>, vector<29x12xbf16> -> vector<29x24xbf16>
    %7 = arith.truncf %1 : vector<24x2xf32> to vector<24x2xbf16>
    %cst = arith.constant dense<0.000000e+00> : vector<29x2xf32>
    %8 = tpu.matmul %6, %7, %cst {dimension_numbers = #tpu.dot_dimension_numbers<[1], [0], [0], [1], [0, 0, 1, 1], [], []>} : vector<29x24xbf16>, vector<24x2xbf16>, vector<29x2xf32> -> vector<29x2xf32>
    %9 = vector.broadcast %2 : vector<1x2xf32> to vector<29x2xf32>
    %10 = arith.addf %8, %9 : vector<29x2xf32>
    %cst_5 = arith.constant 0.000000e+00 : f32
    %11 = vector.broadcast %cst_5 : f32 to vector<29x2xf32>
    %12 = arith.maximumf %10, %11 : vector<29x2xf32>
    %c0_6 = arith.constant 0 : index
    %c0_7 = arith.constant 0 : index
    %13 = vector.load %arg3[%c0_6, %c0_7] : memref<6x3xf32, #tpu.memory_space<vmem>>, vector<6x3xf32>
    %c0_8 = arith.constant 0 : index
    %c0_9 = arith.constant 0 : index
    %14 = vector.load %arg4[%c0_8, %c0_9] : memref<1x3xf32, #tpu.memory_space<vmem>>, vector<1x3xf32>
    %15 = arith.truncf %12 : vector<29x2xf32> to vector<29x2xbf16>
    %16 = vector.extract_strided_slice %15 {offsets = [0, 0], sizes = [27, 2], strides = [1, 1]} : vector<29x2xbf16> to vector<27x2xbf16>
    %17 = vector.extract_strided_slice %15 {offsets = [1, 0], sizes = [27, 2], strides = [1, 1]} : vector<29x2xbf16> to vector<27x2xbf16>
    %18 = vector.extract_strided_slice %15 {offsets = [2, 0], sizes = [27, 2], strides = [1, 1]} : vector<29x2xbf16> to vector<27x2xbf16>
    %19 = tpu.concatenate %16, %17, %18 in 1 : vector<27x2xbf16>, vector<27x2xbf16>, vector<27x2xbf16> -> vector<27x6xbf16>
    %20 = arith.truncf %13 : vector<6x3xf32> to vector<6x3xbf16>
    %cst_10 = arith.constant dense<0.000000e+00> : vector<27x3xf32>
    %21 = tpu.matmul %19, %20, %cst_10 {dimension_numbers = #tpu.dot_dimension_numbers<[1], [0], [0], [1], [0, 0, 1, 1], [], []>} : vector<27x6xbf16>, vector<6x3xbf16>, vector<27x3xf32> -> vector<27x3xf32>
    %22 = vector.broadcast %14 : vector<1x3xf32> to vector<27x3xf32>
    %23 = arith.addf %21, %22 : vector<27x3xf32>
    %cst_11 = arith.constant 0.000000e+00 : f32
    %24 = vector.broadcast %cst_11 : f32 to vector<27x3xf32>
    %25 = arith.maximumf %23, %24 : vector<27x3xf32>
    %c0_12 = arith.constant 0 : index
    %c0_13 = arith.constant 0 : index
    %26 = vector.load %arg5[%c0_12, %c0_13] : memref<12x4xf32, #tpu.memory_space<vmem>>, vector<12x4xf32>
    %c0_14 = arith.constant 0 : index
    %c0_15 = arith.constant 0 : index
    %27 = vector.load %arg6[%c0_14, %c0_15] : memref<1x4xf32, #tpu.memory_space<vmem>>, vector<1x4xf32>
    %28 = arith.truncf %25 : vector<27x3xf32> to vector<27x3xbf16>
    %29 = vector.extract_strided_slice %28 {offsets = [0, 0], sizes = [24, 3], strides = [1, 1]} : vector<27x3xbf16> to vector<24x3xbf16>
    %30 = vector.extract_strided_slice %28 {offsets = [1, 0], sizes = [24, 3], strides = [1, 1]} : vector<27x3xbf16> to vector<24x3xbf16>
    %31 = vector.extract_strided_slice %28 {offsets = [2, 0], sizes = [24, 3], strides = [1, 1]} : vector<27x3xbf16> to vector<24x3xbf16>
    %32 = vector.extract_strided_slice %28 {offsets = [3, 0], sizes = [24, 3], strides = [1, 1]} : vector<27x3xbf16> to vector<24x3xbf16>
    %33 = tpu.concatenate %29, %30, %31, %32 in 1 : vector<24x3xbf16>, vector<24x3xbf16>, vector<24x3xbf16>, vector<24x3xbf16> -> vector<24x12xbf16>
    %34 = arith.truncf %26 : vector<12x4xf32> to vector<12x4xbf16>
    %cst_16 = arith.constant dense<0.000000e+00> : vector<24x4xf32>
    %35 = tpu.matmul %33, %34, %cst_16 {dimension_numbers = #tpu.dot_dimension_numbers<[1], [0], [0], [1], [0, 0, 1, 1], [], []>} : vector<24x12xbf16>, vector<12x4xbf16>, vector<24x4xf32> -> vector<24x4xf32>
    %36 = vector.broadcast %27 : vector<1x4xf32> to vector<24x4xf32>
    %37 = arith.addf %35, %36 : vector<24x4xf32>
    %cst_17 = arith.constant 0.000000e+00 : f32
    %38 = vector.broadcast %cst_17 : f32 to vector<24x4xf32>
    %39 = arith.maximumf %37, %38 : vector<24x4xf32>
    %40 = arith.truncf %39 : vector<24x4xf32> to vector<24x4xbf16>
    %41 = vector.extract_strided_slice %40 {offsets = [0, 0], sizes = [16, 4], strides = [1, 1]} : vector<24x4xbf16> to vector<16x4xbf16>
    %42 = vector.extract_strided_slice %40 {offsets = [1, 0], sizes = [16, 4], strides = [1, 1]} : vector<24x4xbf16> to vector<16x4xbf16>
    %43 = vector.extract_strided_slice %40 {offsets = [2, 0], sizes = [16, 4], strides = [1, 1]} : vector<24x4xbf16> to vector<16x4xbf16>
    %44 = vector.extract_strided_slice %40 {offsets = [3, 0], sizes = [16, 4], strides = [1, 1]} : vector<24x4xbf16> to vector<16x4xbf16>
    %45 = vector.extract_strided_slice %40 {offsets = [4, 0], sizes = [16, 4], strides = [1, 1]} : vector<24x4xbf16> to vector<16x4xbf16>
    %46 = vector.extract_strided_slice %40 {offsets = [5, 0], sizes = [16, 4], strides = [1, 1]} : vector<24x4xbf16> to vector<16x4xbf16>
    %47 = vector.extract_strided_slice %40 {offsets = [6, 0], sizes = [16, 4], strides = [1, 1]} : vector<24x4xbf16> to vector<16x4xbf16>
    %48 = vector.extract_strided_slice %40 {offsets = [7, 0], sizes = [16, 4], strides = [1, 1]} : vector<24x4xbf16> to vector<16x4xbf16>
    %49 = vector.extract_strided_slice %40 {offsets = [8, 0], sizes = [16, 4], strides = [1, 1]} : vector<24x4xbf16> to vector<16x4xbf16>
    %50 = tpu.concatenate %41, %42, %43, %44, %45, %46, %47, %48, %49 in 1 : vector<16x4xbf16>, vector<16x4xbf16>, vector<16x4xbf16>, vector<16x4xbf16>, vector<16x4xbf16>, vector<16x4xbf16>, vector<16x4xbf16>, vector<16x4xbf16>, vector<16x4xbf16> -> vector<16x36xbf16>
    %51 = vector.extract_strided_slice %50 {offsets = [0, 0], sizes = [1, 36], strides = [1, 1]} : vector<16x36xbf16> to vector<1x36xbf16>
    %52 = vector.extract_strided_slice %50 {offsets = [15, 0], sizes = [1, 36], strides = [1, 1]} : vector<16x36xbf16> to vector<1x36xbf16>
    %53 = tpu.concatenate %51, %52 in 0 : vector<1x36xbf16>, vector<1x36xbf16> -> vector<2x36xbf16>
    %c0_18 = arith.constant 0 : index
    %c0_19 = arith.constant 0 : index
    %54 = vector.load %arg7[%c0_18, %c0_19] : memref<36x50xf32, #tpu.memory_space<vmem>>, vector<36x50xf32>
    %55 = arith.truncf %54 : vector<36x50xf32> to vector<36x50xbf16>
    %cst_20 = arith.constant dense<0.000000e+00> : vector<2x50xf32>
    %56 = tpu.matmul %53, %55, %cst_20 {dimension_numbers = #tpu.dot_dimension_numbers<[1], [0], [0], [1], [0, 0, 1, 1], [], []>} : vector<2x36xbf16>, vector<36x50xbf16>, vector<2x50xf32> -> vector<2x50xf32>
    %c0_21 = arith.constant 0 : index
    %c0_22 = arith.constant 0 : index
    %57 = vector.load %arg8[%c0_21, %c0_22] : memref<1x50xf32, #tpu.memory_space<vmem>>, vector<1x50xf32>
    %58 = vector.broadcast %57 : vector<1x50xf32> to vector<2x50xf32>
    %59 = arith.addf %56, %58 : vector<2x50xf32>
    %cst_23 = arith.constant 0.000000e+00 : f32
    %60 = vector.broadcast %cst_23 : f32 to vector<2x50xf32>
    %61 = arith.maximumf %59, %60 : vector<2x50xf32>
    %c0_24 = arith.constant 0 : index
    %c0_25 = arith.constant 0 : index
    %62 = vector.load %arg9[%c0_24, %c0_25] : memref<50x100xf32, #tpu.memory_space<vmem>>, vector<50x100xf32>
    %cst_26 = arith.constant dense<0.000000e+00> : vector<2x100xf32>
    %63 = tpu.matmul %61, %62, %cst_26 {dimension_numbers = #tpu.dot_dimension_numbers<[1], [0], [0], [1], [0, 0, 1, 1], [], []>} : vector<2x50xf32>, vector<50x100xf32>, vector<2x100xf32> -> vector<2x100xf32>
    %c0_27 = arith.constant 0 : index
    %c0_28 = arith.constant 0 : index
    %64 = vector.load %arg10[%c0_27, %c0_28] : memref<1x100xf32, #tpu.memory_space<vmem>>, vector<1x100xf32>
    %65 = vector.broadcast %64 : vector<1x100xf32> to vector<2x100xf32>
    %66 = arith.addf %63, %65 : vector<2x100xf32>
    %67 = vector.extract_strided_slice %66 {offsets = [0, 0], sizes = [2, 50], strides = [1, 1]} : vector<2x100xf32> to vector<2x50xf32>
    %68 = vector.extract_strided_slice %66 {offsets = [0, 50], sizes = [2, 50], strides = [1, 1]} : vector<2x100xf32> to vector<2x50xf32>
    %cst_29 = arith.constant 0.000000e+00 : f32
    %69 = vector.broadcast %cst_29 : f32 to vector<2x50xf32>
    %70 = arith.maximumf %68, %69 : vector<2x50xf32>
    %71 = vector.broadcast %cst_29 : f32 to vector<2x50xf32>
    %72 = arith.subf %68, %71 : vector<2x50xf32>
    %73 = arith.cmpf one, %72, %72 : vector<2x50xf32>
    %74 = vector.broadcast %cst_29 : f32 to vector<2x50xf32>
    %75 = arith.addf %68, %74 : vector<2x50xf32>
    %76 = math.absf %72 : vector<2x50xf32>
    %cst_30 = arith.constant 0.000000e+00 : f32
    %77 = vector.broadcast %cst_30 : f32 to vector<2x50xf32>
    %78 = arith.subf %77, %76 : vector<2x50xf32>
    %79 = math.exp %78 : vector<2x50xf32>
    %80 = math.log1p %79 : vector<2x50xf32>
    %81 = arith.addf %70, %80 : vector<2x50xf32>
    %82 = arith.select %73, %75, %81 : vector<2x50xi1>, vector<2x50xf32>
    %83 = math.log %82 : vector<2x50xf32>
    %cst_31 = arith.constant 1.000000e+00 : f32
    %84 = vector.broadcast %cst_31 : f32 to vector<2x50xf32>
    %85 = arith.addf %84, %83 : vector<2x50xf32>
    %86 = arith.mulf %67, %67 : vector<2x50xf32>
    %87 = arith.subf %85, %86 : vector<2x50xf32>
    %88 = arith.subf %87, %82 : vector<2x50xf32>
    %89 = vector.shape_cast %88 : vector<2x50xf32> to vector<1x2x50xf32>
    %cst_32 = arith.constant dense<0.000000e+00> : vector<1xf32>
    %90 = vector.multi_reduction <add>, %89, %cst_32 [1, 2] : vector<1x2x50xf32> to vector<1xf32>
    %91 = vector.shape_cast %90 : vector<1xf32> to vector<1x1x1xf32>
    %92 = vector.extract %91[0, 0, 0] : f32 from vector<1x1x1xf32>
    %93 = vector.broadcast %92 : f32 to vector<1x1xf32>
    %cst_33 = arith.constant -5.000000e-01 : f32
    %94 = vector.broadcast %cst_33 : f32 to vector<1x1xf32>
    %95 = arith.mulf %94, %93 : vector<1x1xf32>
    %c0_34 = arith.constant 0 : index
    %c0_35 = arith.constant 0 : index
    %96 = vector.load %arg21[%c0_34, %c0_35] : memref<1x1xf32, #tpu.memory_space<vmem>>, vector<1x1xf32>
    tpu.vector_store %arg21[%c0_34, %c0_35], %95 {strides = array<i32>} : memref<1x1xf32, #tpu.memory_space<vmem>>, vector<1x1xf32>,
    %c0_36 = arith.constant 0 : index
    %c0_37 = arith.constant 0 : index
    %97 = vector.load %arg11[%c0_36, %c0_37] : memref<2x50xf32, #tpu.memory_space<vmem>>, vector<2x50xf32>
    %98 = math.sqrt %82 : vector<2x50xf32>
    %99 = arith.mulf %97, %98 : vector<2x50xf32>
    %100 = arith.addf %67, %99 : vector<2x50xf32>
    %c0_38 = arith.constant 0 : index
    %c0_39 = arith.constant 0 : index
    %101 = vector.load %arg12[%c0_38, %c0_39] : memref<50x50xf32, #tpu.memory_space<vmem>>, vector<50x50xf32>
    %cst_40 = arith.constant dense<0.000000e+00> : vector<2x50xf32>
    %102 = tpu.matmul %100, %101, %cst_40 {dimension_numbers = #tpu.dot_dimension_numbers<[1], [0], [0], [1], [0, 0, 1, 1], [], []>} : vector<2x50xf32>, vector<50x50xf32>, vector<2x50xf32> -> vector<2x50xf32>
    %c0_41 = arith.constant 0 : index
    %c0_42 = arith.constant 0 : index
    %103 = vector.load %arg13[%c0_41, %c0_42] : memref<1x50xf32, #tpu.memory_space<vmem>>, vector<1x50xf32>
    %104 = vector.broadcast %103 : vector<1x50xf32> to vector<2x50xf32>
    %105 = arith.addf %102, %104 : vector<2x50xf32>
    %cst_43 = arith.constant 0.000000e+00 : f32
    %106 = vector.broadcast %cst_43 : f32 to vector<2x50xf32>
    %107 = arith.maximumf %105, %106 : vector<2x50xf32>
    %108 = arith.truncf %107 : vector<2x50xf32> to vector<2x50xbf16>
    %c0_44 = arith.constant 0 : index
    %c0_45 = arith.constant 0 : index
    %109 = vector.load %arg14[%c0_44, %c0_45] : memref<50x192xf32, #tpu.memory_space<vmem>>, vector<50x192xf32>
    %110 = arith.truncf %109 : vector<50x192xf32> to vector<50x192xbf16>
    %cst_46 = arith.constant dense<0.000000e+00> : vector<2x192xf32>
    %111 = tpu.matmul %108, %110, %cst_46 {dimension_numbers = #tpu.dot_dimension_numbers<[1], [0], [0], [1], [0, 0, 1, 1], [], []>} : vector<2x50xbf16>, vector<50x192xbf16>, vector<2x192xf32> -> vector<2x192xf32>
    %c0_47 = arith.constant 0 : index
    %c0_48 = arith.constant 0 : index
    %112 = vector.load %arg15[%c0_47, %c0_48] : memref<1x192xf32, #tpu.memory_space<vmem>>, vector<1x192xf32>
    %113 = vector.broadcast %112 : vector<1x192xf32> to vector<2x192xf32>
    %114 = arith.addf %111, %113 : vector<2x192xf32>
    %115 = vector.extract_strided_slice %114 {offsets = [0, 0], sizes = [2, 128], strides = [1, 1]} : vector<2x192xf32> to vector<2x128xf32>
    %116 = vector.extract_strided_slice %114 {offsets = [0, 128], sizes = [2, 64], strides = [1, 1]} : vector<2x192xf32> to vector<2x64xf32>
    %c0_49 = arith.constant 0 : index
    %c0_50 = arith.constant 0 : index
    %117 = vector.load %arg16[%c0_49, %c0_50] : memref<64x192xf32, #tpu.memory_space<vmem>>, vector<64x192xf32>
    %118 = arith.truncf %117 : vector<64x192xf32> to vector<64x192xbf16>
    %c0_51 = arith.constant 0 : index
    %c0_52 = arith.constant 0 : index
    %119 = vector.load %arg17[%c0_51, %c0_52] : memref<1x192xf32, #tpu.memory_space<vmem>>, vector<1x192xf32>
    %120 = vector.shape_cast %119 : vector<1x192xf32> to vector<1x192xf32>
    %121 = vector.broadcast %120 : vector<1x192xf32> to vector<2x192xf32>
    %cst_53 = arith.constant 0.000000e+00 : f32
    %122 = vector.broadcast %cst_53 : f32 to vector<2x64xf32>
    %123 = arith.truncf %122 : vector<2x64xf32> to vector<2x64xbf16>
    %cst_54 = arith.constant dense<0.000000e+00> : vector<2x192xf32>
    %124 = tpu.matmul %123, %118, %cst_54 {dimension_numbers = #tpu.dot_dimension_numbers<[1], [0], [0], [1], [0, 0, 1, 1], [], []>} : vector<2x64xbf16>, vector<64x192xbf16>, vector<2x192xf32> -> vector<2x192xf32>
    %125 = arith.addf %124, %121 : vector<2x192xf32>
    %126 = vector.extract_strided_slice %125 {offsets = [0, 0], sizes = [2, 128], strides = [1, 1]} : vector<2x192xf32> to vector<2x128xf32>
    %127 = arith.addf %115, %126 : vector<2x128xf32>
    %128 = arith.negf %127 : vector<2x128xf32>
    %129 = math.exp %128 : vector<2x128xf32>
    %cst_55 = arith.constant 1.000000e+00 : f32
    %130 = vector.broadcast %cst_55 : f32 to vector<2x128xf32>
    %131 = arith.addf %130, %129 : vector<2x128xf32>
    %132 = arith.divf %130, %131 : vector<2x128xf32>
    %133 = vector.extract_strided_slice %132 {offsets = [0, 0], sizes = [2, 64], strides = [1, 1]} : vector<2x128xf32> to vector<2x64xf32>
    %134 = vector.extract_strided_slice %132 {offsets = [0, 64], sizes = [2, 64], strides = [1, 1]} : vector<2x128xf32> to vector<2x64xf32>
    %135 = vector.extract_strided_slice %125 {offsets = [0, 128], sizes = [2, 64], strides = [1, 1]} : vector<2x192xf32> to vector<2x64xf32>
    %136 = arith.mulf %133, %135 : vector<2x64xf32>
    %137 = arith.addf %116, %136 : vector<2x64xf32>
    %138 = math.tanh %137 : vector<2x64xf32>
    %cst_56 = arith.constant 1.000000e+00 : f32
    %139 = vector.broadcast %cst_56 : f32 to vector<2x64xf32>
    %140 = arith.subf %139, %134 : vector<2x64xf32>
    %141 = arith.mulf %140, %138 : vector<2x64xf32>
    %142 = arith.mulf %134, %122 : vector<2x64xf32>
    %143 = arith.addf %141, %142 : vector<2x64xf32>
    %cst_57 = arith.constant 0.000000e+00 : f32
    %144 = vector.broadcast %cst_57 : f32 to vector<2x64xf32>
    %145 = arith.maximumf %143, %144 : vector<2x64xf32>
    %c0_58 = arith.constant 0 : index
    %c0_59 = arith.constant 0 : index
    %146 = vector.load %arg22[%c0_58, %c0_59] : memref<30x64xf32, #tpu.memory_space<vmem>>, vector<2x64xf32>
    tpu.vector_store %arg22[%c0_58, %c0_59], %145 {strides = array<i32>} : memref<30x64xf32, #tpu.memory_space<vmem>>, vector<2x64xf32>,
    %147 = arith.truncf %143 : vector<2x64xf32> to vector<2x64xbf16>
    %cst_60 = arith.constant dense<0.000000e+00> : vector<2x192xf32>
    %148 = tpu.matmul %147, %118, %cst_60 {dimension_numbers = #tpu.dot_dimension_numbers<[1], [0], [0], [1], [0, 0, 1, 1], [], []>} : vector<2x64xbf16>, vector<64x192xbf16>, vector<2x192xf32> -> vector<2x192xf32>
    %149 = arith.addf %148, %121 : vector<2x192xf32>
    %150 = vector.extract_strided_slice %149 {offsets = [0, 0], sizes = [2, 128], strides = [1, 1]} : vector<2x192xf32> to vector<2x128xf32>
    %151 = arith.addf %115, %150 : vector<2x128xf32>
    %152 = arith.negf %151 : vector<2x128xf32>
    %153 = math.exp %152 : vector<2x128xf32>
    %cst_61 = arith.constant 1.000000e+00 : f32
    %154 = vector.broadcast %cst_61 : f32 to vector<2x128xf32>
    %155 = arith.addf %154, %153 : vector<2x128xf32>
    %156 = arith.divf %154, %155 : vector<2x128xf32>
    %157 = vector.extract_strided_slice %156 {offsets = [0, 0], sizes = [2, 64], strides = [1, 1]} : vector<2x128xf32> to vector<2x64xf32>
    %158 = vector.extract_strided_slice %156 {offsets = [0, 64], sizes = [2, 64], strides = [1, 1]} : vector<2x128xf32> to vector<2x64xf32>
    %159 = vector.extract_strided_slice %149 {offsets = [0, 128], sizes = [2, 64], strides = [1, 1]} : vector<2x192xf32> to vector<2x64xf32>
    %160 = arith.mulf %157, %159 : vector<2x64xf32>
    %161 = arith.addf %116, %160 : vector<2x64xf32>
    %162 = math.tanh %161 : vector<2x64xf32>
    %cst_62 = arith.constant 1.000000e+00 : f32
    %163 = vector.broadcast %cst_62 : f32 to vector<2x64xf32>
    %164 = arith.subf %163, %158 : vector<2x64xf32>
    %165 = arith.mulf %164, %162 : vector<2x64xf32>
    %166 = arith.mulf %158, %143 : vector<2x64xf32>
    %167 = arith.addf %165, %166 : vector<2x64xf32>
    %cst_63 = arith.constant 0.000000e+00 : f32
    %168 = vector.broadcast %cst_63 : f32 to vector<2x64xf32>
    %169 = arith.maximumf %167, %168 : vector<2x64xf32>
    %c2 = arith.constant 2 : index
    %c0_64 = arith.constant 0 : index
    %170 = vector.load %arg22[%c2, %c0_64] : memref<30x64xf32, #tpu.memory_space<vmem>>, vector<2x64xf32>
    tpu.vector_store %arg22[%c2, %c0_64], %169 {strides = array<i32>} : memref<30x64xf32, #tpu.memory_space<vmem>>, vector<2x64xf32>,
    %171 = arith.truncf %167 : vector<2x64xf32> to vector<2x64xbf16>
    %cst_65 = arith.constant dense<0.000000e+00> : vector<2x192xf32>
    %172 = tpu.matmul %171, %118, %cst_65 {dimension_numbers = #tpu.dot_dimension_numbers<[1], [0], [0], [1], [0, 0, 1, 1], [], []>} : vector<2x64xbf16>, vector<64x192xbf16>, vector<2x192xf32> -> vector<2x192xf32>
    %173 = arith.addf %172, %121 : vector<2x192xf32>
    %174 = vector.extract_strided_slice %173 {offsets = [0, 0], sizes = [2, 128], strides = [1, 1]} : vector<2x192xf32> to vector<2x128xf32>
    %175 = arith.addf %115, %174 : vector<2x128xf32>
    %176 = arith.negf %175 : vector<2x128xf32>
    %177 = math.exp %176 : vector<2x128xf32>
    %cst_66 = arith.constant 1.000000e+00 : f32
    %178 = vector.broadcast %cst_66 : f32 to vector<2x128xf32>
    %179 = arith.addf %178, %177 : vector<2x128xf32>
    %180 = arith.divf %178, %179 : vector<2x128xf32>
    %181 = vector.extract_strided_slice %180 {offsets = [0, 0], sizes = [2, 64], strides = [1, 1]} : vector<2x128xf32> to vector<2x64xf32>
    %182 = vector.extract_strided_slice %180 {offsets = [0, 64], sizes = [2, 64], strides = [1, 1]} : vector<2x128xf32> to vector<2x64xf32>
    %183 = vector.extract_strided_slice %173 {offsets = [0, 128], sizes = [2, 64], strides = [1, 1]} : vector<2x192xf32> to vector<2x64xf32>
    %184 = arith.mulf %181, %183 : vector<2x64xf32>
    %185 = arith.addf %116, %184 : vector<2x64xf32>
    %186 = math.tanh %185 : vector<2x64xf32>
    %cst_67 = arith.constant 1.000000e+00 : f32
    %187 = vector.broadcast %cst_67 : f32 to vector<2x64xf32>
    %188 = arith.subf %187, %182 : vector<2x64xf32>
    %189 = arith.mulf %188, %186 : vector<2x64xf32>
    %190 = arith.mulf %182, %167 : vector<2x64xf32>
    %191 = arith.addf %189, %190 : vector<2x64xf32>
    %cst_68 = arith.constant 0.000000e+00 : f32
    %192 = vector.broadcast %cst_68 : f32 to vector<2x64xf32>
    %193 = arith.maximumf %191, %192 : vector<2x64xf32>
    %c4 = arith.constant 4 : index
    %c0_69 = arith.constant 0 : index
    %194 = vector.load %arg22[%c4, %c0_69] : memref<30x64xf32, #tpu.memory_space<vmem>>, vector<2x64xf32>
    tpu.vector_store %arg22[%c4, %c0_69], %193 {strides = array<i32>} : memref<30x64xf32, #tpu.memory_space<vmem>>, vector<2x64xf32>,
    %195 = arith.truncf %191 : vector<2x64xf32> to vector<2x64xbf16>
    %cst_70 = arith.constant dense<0.000000e+00> : vector<2x192xf32>
    %196 = tpu.matmul %195, %118, %cst_70 {dimension_numbers = #tpu.dot_dimension_numbers<[1], [0], [0], [1], [0, 0, 1, 1], [], []>} : vector<2x64xbf16>, vector<64x192xbf16>, vector<2x192xf32> -> vector<2x192xf32>
    %197 = arith.addf %196, %121 : vector<2x192xf32>
    %198 = vector.extract_strided_slice %197 {offsets = [0, 0], sizes = [2, 128], strides = [1, 1]} : vector<2x192xf32> to vector<2x128xf32>
    %199 = arith.addf %115, %198 : vector<2x128xf32>
    %200 = arith.negf %199 : vector<2x128xf32>
    %201 = math.exp %200 : vector<2x128xf32>
    %cst_71 = arith.constant 1.000000e+00 : f32
    %202 = vector.broadcast %cst_71 : f32 to vector<2x128xf32>
    %203 = arith.addf %202, %201 : vector<2x128xf32>
    %204 = arith.divf %202, %203 : vector<2x128xf32>
    %205 = vector.extract_strided_slice %204 {offsets = [0, 0], sizes = [2, 64], strides = [1, 1]} : vector<2x128xf32> to vector<2x64xf32>
    %206 = vector.extract_strided_slice %204 {offsets = [0, 64], sizes = [2, 64], strides = [1, 1]} : vector<2x128xf32> to vector<2x64xf32>
    %207 = vector.extract_strided_slice %197 {offsets = [0, 128], sizes = [2, 64], strides = [1, 1]} : vector<2x192xf32> to vector<2x64xf32>
    %208 = arith.mulf %205, %207 : vector<2x64xf32>
    %209 = arith.addf %116, %208 : vector<2x64xf32>
    %210 = math.tanh %209 : vector<2x64xf32>
    %cst_72 = arith.constant 1.000000e+00 : f32
    %211 = vector.broadcast %cst_72 : f32 to vector<2x64xf32>
    %212 = arith.subf %211, %206 : vector<2x64xf32>
    %213 = arith.mulf %212, %210 : vector<2x64xf32>
    %214 = arith.mulf %206, %191 : vector<2x64xf32>
    %215 = arith.addf %213, %214 : vector<2x64xf32>
    %cst_73 = arith.constant 0.000000e+00 : f32
    %216 = vector.broadcast %cst_73 : f32 to vector<2x64xf32>
    %217 = arith.maximumf %215, %216 : vector<2x64xf32>
    %c6 = arith.constant 6 : index
    %c0_74 = arith.constant 0 : index
    %218 = vector.load %arg22[%c6, %c0_74] : memref<30x64xf32, #tpu.memory_space<vmem>>, vector<2x64xf32>
    tpu.vector_store %arg22[%c6, %c0_74], %217 {strides = array<i32>} : memref<30x64xf32, #tpu.memory_space<vmem>>, vector<2x64xf32>,
    %219 = arith.truncf %215 : vector<2x64xf32> to vector<2x64xbf16>
    %cst_75 = arith.constant dense<0.000000e+00> : vector<2x192xf32>
    %220 = tpu.matmul %219, %118, %cst_75 {dimension_numbers = #tpu.dot_dimension_numbers<[1], [0], [0], [1], [0, 0, 1, 1], [], []>} : vector<2x64xbf16>, vector<64x192xbf16>, vector<2x192xf32> -> vector<2x192xf32>
    %221 = arith.addf %220, %121 : vector<2x192xf32>
    %222 = vector.extract_strided_slice %221 {offsets = [0, 0], sizes = [2, 128], strides = [1, 1]} : vector<2x192xf32> to vector<2x128xf32>
    %223 = arith.addf %115, %222 : vector<2x128xf32>
    %224 = arith.negf %223 : vector<2x128xf32>
    %225 = math.exp %224 : vector<2x128xf32>
    %cst_76 = arith.constant 1.000000e+00 : f32
    %226 = vector.broadcast %cst_76 : f32 to vector<2x128xf32>
    %227 = arith.addf %226, %225 : vector<2x128xf32>
    %228 = arith.divf %226, %227 : vector<2x128xf32>
    %229 = vector.extract_strided_slice %228 {offsets = [0, 0], sizes = [2, 64], strides = [1, 1]} : vector<2x128xf32> to vector<2x64xf32>
    %230 = vector.extract_strided_slice %228 {offsets = [0, 64], sizes = [2, 64], strides = [1, 1]} : vector<2x128xf32> to vector<2x64xf32>
    %231 = vector.extract_strided_slice %221 {offsets = [0, 128], sizes = [2, 64], strides = [1, 1]} : vector<2x192xf32> to vector<2x64xf32>
    %232 = arith.mulf %229, %231 : vector<2x64xf32>
    %233 = arith.addf %116, %232 : vector<2x64xf32>
    %234 = math.tanh %233 : vector<2x64xf32>
    %cst_77 = arith.constant 1.000000e+00 : f32
    %235 = vector.broadcast %cst_77 : f32 to vector<2x64xf32>
    %236 = arith.subf %235, %230 : vector<2x64xf32>
    %237 = arith.mulf %236, %234 : vector<2x64xf32>
    %238 = arith.mulf %230, %215 : vector<2x64xf32>
    %239 = arith.addf %237, %238 : vector<2x64xf32>
    %cst_78 = arith.constant 0.000000e+00 : f32
    %240 = vector.broadcast %cst_78 : f32 to vector<2x64xf32>
    %241 = arith.maximumf %239, %240 : vector<2x64xf32>
    %c8 = arith.constant 8 : index
    %c0_79 = arith.constant 0 : index
    %242 = vector.load %arg22[%c8, %c0_79] : memref<30x64xf32, #tpu.memory_space<vmem>>, vector<2x64xf32>
    tpu.vector_store %arg22[%c8, %c0_79], %241 {strides = array<i32>} : memref<30x64xf32, #tpu.memory_space<vmem>>, vector<2x64xf32>,
    %243 = arith.truncf %239 : vector<2x64xf32> to vector<2x64xbf16>
    %cst_80 = arith.constant dense<0.000000e+00> : vector<2x192xf32>
    %244 = tpu.matmul %243, %118, %cst_80 {dimension_numbers = #tpu.dot_dimension_numbers<[1], [0], [0], [1], [0, 0, 1, 1], [], []>} : vector<2x64xbf16>, vector<64x192xbf16>, vector<2x192xf32> -> vector<2x192xf32>
    %245 = arith.addf %244, %121 : vector<2x192xf32>
    %246 = vector.extract_strided_slice %245 {offsets = [0, 0], sizes = [2, 128], strides = [1, 1]} : vector<2x192xf32> to vector<2x128xf32>
    %247 = arith.addf %115, %246 : vector<2x128xf32>
    %248 = arith.negf %247 : vector<2x128xf32>
    %249 = math.exp %248 : vector<2x128xf32>
    %cst_81 = arith.constant 1.000000e+00 : f32
    %250 = vector.broadcast %cst_81 : f32 to vector<2x128xf32>
    %251 = arith.addf %250, %249 : vector<2x128xf32>
    %252 = arith.divf %250, %251 : vector<2x128xf32>
    %253 = vector.extract_strided_slice %252 {offsets = [0, 0], sizes = [2, 64], strides = [1, 1]} : vector<2x128xf32> to vector<2x64xf32>
    %254 = vector.extract_strided_slice %252 {offsets = [0, 64], sizes = [2, 64], strides = [1, 1]} : vector<2x128xf32> to vector<2x64xf32>
    %255 = vector.extract_strided_slice %245 {offsets = [0, 128], sizes = [2, 64], strides = [1, 1]} : vector<2x192xf32> to vector<2x64xf32>
    %256 = arith.mulf %253, %255 : vector<2x64xf32>
    %257 = arith.addf %116, %256 : vector<2x64xf32>
    %258 = math.tanh %257 : vector<2x64xf32>
    %cst_82 = arith.constant 1.000000e+00 : f32
    %259 = vector.broadcast %cst_82 : f32 to vector<2x64xf32>
    %260 = arith.subf %259, %254 : vector<2x64xf32>
    %261 = arith.mulf %260, %258 : vector<2x64xf32>
    %262 = arith.mulf %254, %239 : vector<2x64xf32>
    %263 = arith.addf %261, %262 : vector<2x64xf32>
    %cst_83 = arith.constant 0.000000e+00 : f32
    %264 = vector.broadcast %cst_83 : f32 to vector<2x64xf32>
    %265 = arith.maximumf %263, %264 : vector<2x64xf32>
    %c10 = arith.constant 10 : index
    %c0_84 = arith.constant 0 : index
    %266 = vector.load %arg22[%c10, %c0_84] : memref<30x64xf32, #tpu.memory_space<vmem>>, vector<2x64xf32>
    tpu.vector_store %arg22[%c10, %c0_84], %265 {strides = array<i32>} : memref<30x64xf32, #tpu.memory_space<vmem>>, vector<2x64xf32>,
    %267 = arith.truncf %263 : vector<2x64xf32> to vector<2x64xbf16>
    %cst_85 = arith.constant dense<0.000000e+00> : vector<2x192xf32>
    %268 = tpu.matmul %267, %118, %cst_85 {dimension_numbers = #tpu.dot_dimension_numbers<[1], [0], [0], [1], [0, 0, 1, 1], [], []>} : vector<2x64xbf16>, vector<64x192xbf16>, vector<2x192xf32> -> vector<2x192xf32>
    %269 = arith.addf %268, %121 : vector<2x192xf32>
    %270 = vector.extract_strided_slice %269 {offsets = [0, 0], sizes = [2, 128], strides = [1, 1]} : vector<2x192xf32> to vector<2x128xf32>
    %271 = arith.addf %115, %270 : vector<2x128xf32>
    %272 = arith.negf %271 : vector<2x128xf32>
    %273 = math.exp %272 : vector<2x128xf32>
    %cst_86 = arith.constant 1.000000e+00 : f32
    %274 = vector.broadcast %cst_86 : f32 to vector<2x128xf32>
    %275 = arith.addf %274, %273 : vector<2x128xf32>
    %276 = arith.divf %274, %275 : vector<2x128xf32>
    %277 = vector.extract_strided_slice %276 {offsets = [0, 0], sizes = [2, 64], strides = [1, 1]} : vector<2x128xf32> to vector<2x64xf32>
    %278 = vector.extract_strided_slice %276 {offsets = [0, 64], sizes = [2, 64], strides = [1, 1]} : vector<2x128xf32> to vector<2x64xf32>
    %279 = vector.extract_strided_slice %269 {offsets = [0, 128], sizes = [2, 64], strides = [1, 1]} : vector<2x192xf32> to vector<2x64xf32>
    %280 = arith.mulf %277, %279 : vector<2x64xf32>
    %281 = arith.addf %116, %280 : vector<2x64xf32>
    %282 = math.tanh %281 : vector<2x64xf32>
    %cst_87 = arith.constant 1.000000e+00 : f32
    %283 = vector.broadcast %cst_87 : f32 to vector<2x64xf32>
    %284 = arith.subf %283, %278 : vector<2x64xf32>
    %285 = arith.mulf %284, %282 : vector<2x64xf32>
    %286 = arith.mulf %278, %263 : vector<2x64xf32>
    %287 = arith.addf %285, %286 : vector<2x64xf32>
    %cst_88 = arith.constant 0.000000e+00 : f32
    %288 = vector.broadcast %cst_88 : f32 to vector<2x64xf32>
    %289 = arith.maximumf %287, %288 : vector<2x64xf32>
    %c12 = arith.constant 12 : index
    %c0_89 = arith.constant 0 : index
    %290 = vector.load %arg22[%c12, %c0_89] : memref<30x64xf32, #tpu.memory_space<vmem>>, vector<2x64xf32>
    tpu.vector_store %arg22[%c12, %c0_89], %289 {strides = array<i32>} : memref<30x64xf32, #tpu.memory_space<vmem>>, vector<2x64xf32>,
    %291 = arith.truncf %287 : vector<2x64xf32> to vector<2x64xbf16>
    %cst_90 = arith.constant dense<0.000000e+00> : vector<2x192xf32>
    %292 = tpu.matmul %291, %118, %cst_90 {dimension_numbers = #tpu.dot_dimension_numbers<[1], [0], [0], [1], [0, 0, 1, 1], [], []>} : vector<2x64xbf16>, vector<64x192xbf16>, vector<2x192xf32> -> vector<2x192xf32>
    %293 = arith.addf %292, %121 : vector<2x192xf32>
    %294 = vector.extract_strided_slice %293 {offsets = [0, 0], sizes = [2, 128], strides = [1, 1]} : vector<2x192xf32> to vector<2x128xf32>
    %295 = arith.addf %115, %294 : vector<2x128xf32>
    %296 = arith.negf %295 : vector<2x128xf32>
    %297 = math.exp %296 : vector<2x128xf32>
    %cst_91 = arith.constant 1.000000e+00 : f32
    %298 = vector.broadcast %cst_91 : f32 to vector<2x128xf32>
    %299 = arith.addf %298, %297 : vector<2x128xf32>
    %300 = arith.divf %298, %299 : vector<2x128xf32>
    %301 = vector.extract_strided_slice %300 {offsets = [0, 0], sizes = [2, 64], strides = [1, 1]} : vector<2x128xf32> to vector<2x64xf32>
    %302 = vector.extract_strided_slice %300 {offsets = [0, 64], sizes = [2, 64], strides = [1, 1]} : vector<2x128xf32> to vector<2x64xf32>
    %303 = vector.extract_strided_slice %293 {offsets = [0, 128], sizes = [2, 64], strides = [1, 1]} : vector<2x192xf32> to vector<2x64xf32>
    %304 = arith.mulf %301, %303 : vector<2x64xf32>
    %305 = arith.addf %116, %304 : vector<2x64xf32>
    %306 = math.tanh %305 : vector<2x64xf32>
    %cst_92 = arith.constant 1.000000e+00 : f32
    %307 = vector.broadcast %cst_92 : f32 to vector<2x64xf32>
    %308 = arith.subf %307, %302 : vector<2x64xf32>
    %309 = arith.mulf %308, %306 : vector<2x64xf32>
    %310 = arith.mulf %302, %287 : vector<2x64xf32>
    %311 = arith.addf %309, %310 : vector<2x64xf32>
    %cst_93 = arith.constant 0.000000e+00 : f32
    %312 = vector.broadcast %cst_93 : f32 to vector<2x64xf32>
    %313 = arith.maximumf %311, %312 : vector<2x64xf32>
    %c14 = arith.constant 14 : index
    %c0_94 = arith.constant 0 : index
    %314 = vector.load %arg22[%c14, %c0_94] : memref<30x64xf32, #tpu.memory_space<vmem>>, vector<2x64xf32>
    tpu.vector_store %arg22[%c14, %c0_94], %313 {strides = array<i32>} : memref<30x64xf32, #tpu.memory_space<vmem>>, vector<2x64xf32>,
    %315 = arith.truncf %311 : vector<2x64xf32> to vector<2x64xbf16>
    %cst_95 = arith.constant dense<0.000000e+00> : vector<2x192xf32>
    %316 = tpu.matmul %315, %118, %cst_95 {dimension_numbers = #tpu.dot_dimension_numbers<[1], [0], [0], [1], [0, 0, 1, 1], [], []>} : vector<2x64xbf16>, vector<64x192xbf16>, vector<2x192xf32> -> vector<2x192xf32>
    %317 = arith.addf %316, %121 : vector<2x192xf32>
    %318 = vector.extract_strided_slice %317 {offsets = [0, 0], sizes = [2, 128], strides = [1, 1]} : vector<2x192xf32> to vector<2x128xf32>
    %319 = arith.addf %115, %318 : vector<2x128xf32>
    %320 = arith.negf %319 : vector<2x128xf32>
    %321 = math.exp %320 : vector<2x128xf32>
    %cst_96 = arith.constant 1.000000e+00 : f32
    %322 = vector.broadcast %cst_96 : f32 to vector<2x128xf32>
    %323 = arith.addf %322, %321 : vector<2x128xf32>
    %324 = arith.divf %322, %323 : vector<2x128xf32>
    %325 = vector.extract_strided_slice %324 {offsets = [0, 0], sizes = [2, 64], strides = [1, 1]} : vector<2x128xf32> to vector<2x64xf32>
    %326 = vector.extract_strided_slice %324 {offsets = [0, 64], sizes = [2, 64], strides = [1, 1]} : vector<2x128xf32> to vector<2x64xf32>
    %327 = vector.extract_strided_slice %317 {offsets = [0, 128], sizes = [2, 64], strides = [1, 1]} : vector<2x192xf32> to vector<2x64xf32>
    %328 = arith.mulf %325, %327 : vector<2x64xf32>
    %329 = arith.addf %116, %328 : vector<2x64xf32>
    %330 = math.tanh %329 : vector<2x64xf32>
    %cst_97 = arith.constant 1.000000e+00 : f32
    %331 = vector.broadcast %cst_97 : f32 to vector<2x64xf32>
    %332 = arith.subf %331, %326 : vector<2x64xf32>
    %333 = arith.mulf %332, %330 : vector<2x64xf32>
    %334 = arith.mulf %326, %311 : vector<2x64xf32>
    %335 = arith.addf %333, %334 : vector<2x64xf32>
    %cst_98 = arith.constant 0.000000e+00 : f32
    %336 = vector.broadcast %cst_98 : f32 to vector<2x64xf32>
    %337 = arith.maximumf %335, %336 : vector<2x64xf32>
    %c16 = arith.constant 16 : index
    %c0_99 = arith.constant 0 : index
    %338 = vector.load %arg22[%c16, %c0_99] : memref<30x64xf32, #tpu.memory_space<vmem>>, vector<2x64xf32>
    tpu.vector_store %arg22[%c16, %c0_99], %337 {strides = array<i32>} : memref<30x64xf32, #tpu.memory_space<vmem>>, vector<2x64xf32>,
    %339 = arith.truncf %335 : vector<2x64xf32> to vector<2x64xbf16>
    %cst_100 = arith.constant dense<0.000000e+00> : vector<2x192xf32>
    %340 = tpu.matmul %339, %118, %cst_100 {dimension_numbers = #tpu.dot_dimension_numbers<[1], [0], [0], [1], [0, 0, 1, 1], [], []>} : vector<2x64xbf16>, vector<64x192xbf16>, vector<2x192xf32> -> vector<2x192xf32>
    %341 = arith.addf %340, %121 : vector<2x192xf32>
    %342 = vector.extract_strided_slice %341 {offsets = [0, 0], sizes = [2, 128], strides = [1, 1]} : vector<2x192xf32> to vector<2x128xf32>
    %343 = arith.addf %115, %342 : vector<2x128xf32>
    %344 = arith.negf %343 : vector<2x128xf32>
    %345 = math.exp %344 : vector<2x128xf32>
    %cst_101 = arith.constant 1.000000e+00 : f32
    %346 = vector.broadcast %cst_101 : f32 to vector<2x128xf32>
    %347 = arith.addf %346, %345 : vector<2x128xf32>
    %348 = arith.divf %346, %347 : vector<2x128xf32>
    %349 = vector.extract_strided_slice %348 {offsets = [0, 0], sizes = [2, 64], strides = [1, 1]} : vector<2x128xf32> to vector<2x64xf32>
    %350 = vector.extract_strided_slice %348 {offsets = [0, 64], sizes = [2, 64], strides = [1, 1]} : vector<2x128xf32> to vector<2x64xf32>
    %351 = vector.extract_strided_slice %341 {offsets = [0, 128], sizes = [2, 64], strides = [1, 1]} : vector<2x192xf32> to vector<2x64xf32>
    %352 = arith.mulf %349, %351 : vector<2x64xf32>
    %353 = arith.addf %116, %352 : vector<2x64xf32>
    %354 = math.tanh %353 : vector<2x64xf32>
    %cst_102 = arith.constant 1.000000e+00 : f32
    %355 = vector.broadcast %cst_102 : f32 to vector<2x64xf32>
    %356 = arith.subf %355, %350 : vector<2x64xf32>
    %357 = arith.mulf %356, %354 : vector<2x64xf32>
    %358 = arith.mulf %350, %335 : vector<2x64xf32>
    %359 = arith.addf %357, %358 : vector<2x64xf32>
    %cst_103 = arith.constant 0.000000e+00 : f32
    %360 = vector.broadcast %cst_103 : f32 to vector<2x64xf32>
    %361 = arith.maximumf %359, %360 : vector<2x64xf32>
    %c18 = arith.constant 18 : index
    %c0_104 = arith.constant 0 : index
    %362 = vector.load %arg22[%c18, %c0_104] : memref<30x64xf32, #tpu.memory_space<vmem>>, vector<2x64xf32>
    tpu.vector_store %arg22[%c18, %c0_104], %361 {strides = array<i32>} : memref<30x64xf32, #tpu.memory_space<vmem>>, vector<2x64xf32>,
    %363 = arith.truncf %359 : vector<2x64xf32> to vector<2x64xbf16>
    %cst_105 = arith.constant dense<0.000000e+00> : vector<2x192xf32>
    %364 = tpu.matmul %363, %118, %cst_105 {dimension_numbers = #tpu.dot_dimension_numbers<[1], [0], [0], [1], [0, 0, 1, 1], [], []>} : vector<2x64xbf16>, vector<64x192xbf16>, vector<2x192xf32> -> vector<2x192xf32>
    %365 = arith.addf %364, %121 : vector<2x192xf32>
    %366 = vector.extract_strided_slice %365 {offsets = [0, 0], sizes = [2, 128], strides = [1, 1]} : vector<2x192xf32> to vector<2x128xf32>
    %367 = arith.addf %115, %366 : vector<2x128xf32>
    %368 = arith.negf %367 : vector<2x128xf32>
    %369 = math.exp %368 : vector<2x128xf32>
    %cst_106 = arith.constant 1.000000e+00 : f32
    %370 = vector.broadcast %cst_106 : f32 to vector<2x128xf32>
    %371 = arith.addf %370, %369 : vector<2x128xf32>
    %372 = arith.divf %370, %371 : vector<2x128xf32>
    %373 = vector.extract_strided_slice %372 {offsets = [0, 0], sizes = [2, 64], strides = [1, 1]} : vector<2x128xf32> to vector<2x64xf32>
    %374 = vector.extract_strided_slice %372 {offsets = [0, 64], sizes = [2, 64], strides = [1, 1]} : vector<2x128xf32> to vector<2x64xf32>
    %375 = vector.extract_strided_slice %365 {offsets = [0, 128], sizes = [2, 64], strides = [1, 1]} : vector<2x192xf32> to vector<2x64xf32>
    %376 = arith.mulf %373, %375 : vector<2x64xf32>
    %377 = arith.addf %116, %376 : vector<2x64xf32>
    %378 = math.tanh %377 : vector<2x64xf32>
    %cst_107 = arith.constant 1.000000e+00 : f32
    %379 = vector.broadcast %cst_107 : f32 to vector<2x64xf32>
    %380 = arith.subf %379, %374 : vector<2x64xf32>
    %381 = arith.mulf %380, %378 : vector<2x64xf32>
    %382 = arith.mulf %374, %359 : vector<2x64xf32>
    %383 = arith.addf %381, %382 : vector<2x64xf32>
    %cst_108 = arith.constant 0.000000e+00 : f32
    %384 = vector.broadcast %cst_108 : f32 to vector<2x64xf32>
    %385 = arith.maximumf %383, %384 : vector<2x64xf32>
    %c20 = arith.constant 20 : index
    %c0_109 = arith.constant 0 : index
    %386 = vector.load %arg22[%c20, %c0_109] : memref<30x64xf32, #tpu.memory_space<vmem>>, vector<2x64xf32>
    tpu.vector_store %arg22[%c20, %c0_109], %385 {strides = array<i32>} : memref<30x64xf32, #tpu.memory_space<vmem>>, vector<2x64xf32>,
    %387 = arith.truncf %383 : vector<2x64xf32> to vector<2x64xbf16>
    %cst_110 = arith.constant dense<0.000000e+00> : vector<2x192xf32>
    %388 = tpu.matmul %387, %118, %cst_110 {dimension_numbers = #tpu.dot_dimension_numbers<[1], [0], [0], [1], [0, 0, 1, 1], [], []>} : vector<2x64xbf16>, vector<64x192xbf16>, vector<2x192xf32> -> vector<2x192xf32>
    %389 = arith.addf %388, %121 : vector<2x192xf32>
    %390 = vector.extract_strided_slice %389 {offsets = [0, 0], sizes = [2, 128], strides = [1, 1]} : vector<2x192xf32> to vector<2x128xf32>
    %391 = arith.addf %115, %390 : vector<2x128xf32>
    %392 = arith.negf %391 : vector<2x128xf32>
    %393 = math.exp %392 : vector<2x128xf32>
    %cst_111 = arith.constant 1.000000e+00 : f32
    %394 = vector.broadcast %cst_111 : f32 to vector<2x128xf32>
    %395 = arith.addf %394, %393 : vector<2x128xf32>
    %396 = arith.divf %394, %395 : vector<2x128xf32>
    %397 = vector.extract_strided_slice %396 {offsets = [0, 0], sizes = [2, 64], strides = [1, 1]} : vector<2x128xf32> to vector<2x64xf32>
    %398 = vector.extract_strided_slice %396 {offsets = [0, 64], sizes = [2, 64], strides = [1, 1]} : vector<2x128xf32> to vector<2x64xf32>
    %399 = vector.extract_strided_slice %389 {offsets = [0, 128], sizes = [2, 64], strides = [1, 1]} : vector<2x192xf32> to vector<2x64xf32>
    %400 = arith.mulf %397, %399 : vector<2x64xf32>
    %401 = arith.addf %116, %400 : vector<2x64xf32>
    %402 = math.tanh %401 : vector<2x64xf32>
    %cst_112 = arith.constant 1.000000e+00 : f32
    %403 = vector.broadcast %cst_112 : f32 to vector<2x64xf32>
    %404 = arith.subf %403, %398 : vector<2x64xf32>
    %405 = arith.mulf %404, %402 : vector<2x64xf32>
    %406 = arith.mulf %398, %383 : vector<2x64xf32>
    %407 = arith.addf %405, %406 : vector<2x64xf32>
    %cst_113 = arith.constant 0.000000e+00 : f32
    %408 = vector.broadcast %cst_113 : f32 to vector<2x64xf32>
    %409 = arith.maximumf %407, %408 : vector<2x64xf32>
    %c22 = arith.constant 22 : index
    %c0_114 = arith.constant 0 : index
    %410 = vector.load %arg22[%c22, %c0_114] : memref<30x64xf32, #tpu.memory_space<vmem>>, vector<2x64xf32>
    tpu.vector_store %arg22[%c22, %c0_114], %409 {strides = array<i32>} : memref<30x64xf32, #tpu.memory_space<vmem>>, vector<2x64xf32>,
    %411 = arith.truncf %407 : vector<2x64xf32> to vector<2x64xbf16>
    %cst_115 = arith.constant dense<0.000000e+00> : vector<2x192xf32>
    %412 = tpu.matmul %411, %118, %cst_115 {dimension_numbers = #tpu.dot_dimension_numbers<[1], [0], [0], [1], [0, 0, 1, 1], [], []>} : vector<2x64xbf16>, vector<64x192xbf16>, vector<2x192xf32> -> vector<2x192xf32>
    %413 = arith.addf %412, %121 : vector<2x192xf32>
    %414 = vector.extract_strided_slice %413 {offsets = [0, 0], sizes = [2, 128], strides = [1, 1]} : vector<2x192xf32> to vector<2x128xf32>
    %415 = arith.addf %115, %414 : vector<2x128xf32>
    %416 = arith.negf %415 : vector<2x128xf32>
    %417 = math.exp %416 : vector<2x128xf32>
    %cst_116 = arith.constant 1.000000e+00 : f32
    %418 = vector.broadcast %cst_116 : f32 to vector<2x128xf32>
    %419 = arith.addf %418, %417 : vector<2x128xf32>
    %420 = arith.divf %418, %419 : vector<2x128xf32>
    %421 = vector.extract_strided_slice %420 {offsets = [0, 0], sizes = [2, 64], strides = [1, 1]} : vector<2x128xf32> to vector<2x64xf32>
    %422 = vector.extract_strided_slice %420 {offsets = [0, 64], sizes = [2, 64], strides = [1, 1]} : vector<2x128xf32> to vector<2x64xf32>
    %423 = vector.extract_strided_slice %413 {offsets = [0, 128], sizes = [2, 64], strides = [1, 1]} : vector<2x192xf32> to vector<2x64xf32>
    %424 = arith.mulf %421, %423 : vector<2x64xf32>
    %425 = arith.addf %116, %424 : vector<2x64xf32>
    %426 = math.tanh %425 : vector<2x64xf32>
    %cst_117 = arith.constant 1.000000e+00 : f32
    %427 = vector.broadcast %cst_117 : f32 to vector<2x64xf32>
    %428 = arith.subf %427, %422 : vector<2x64xf32>
    %429 = arith.mulf %428, %426 : vector<2x64xf32>
    %430 = arith.mulf %422, %407 : vector<2x64xf32>
    %431 = arith.addf %429, %430 : vector<2x64xf32>
    %cst_118 = arith.constant 0.000000e+00 : f32
    %432 = vector.broadcast %cst_118 : f32 to vector<2x64xf32>
    %433 = arith.maximumf %431, %432 : vector<2x64xf32>
    %c24 = arith.constant 24 : index
    %c0_119 = arith.constant 0 : index
    %434 = vector.load %arg22[%c24, %c0_119] : memref<30x64xf32, #tpu.memory_space<vmem>>, vector<2x64xf32>
    tpu.vector_store %arg22[%c24, %c0_119], %433 {strides = array<i32>} : memref<30x64xf32, #tpu.memory_space<vmem>>, vector<2x64xf32>,
    %435 = arith.truncf %431 : vector<2x64xf32> to vector<2x64xbf16>
    %cst_120 = arith.constant dense<0.000000e+00> : vector<2x192xf32>
    %436 = tpu.matmul %435, %118, %cst_120 {dimension_numbers = #tpu.dot_dimension_numbers<[1], [0], [0], [1], [0, 0, 1, 1], [], []>} : vector<2x64xbf16>, vector<64x192xbf16>, vector<2x192xf32> -> vector<2x192xf32>
    %437 = arith.addf %436, %121 : vector<2x192xf32>
    %438 = vector.extract_strided_slice %437 {offsets = [0, 0], sizes = [2, 128], strides = [1, 1]} : vector<2x192xf32> to vector<2x128xf32>
    %439 = arith.addf %115, %438 : vector<2x128xf32>
    %440 = arith.negf %439 : vector<2x128xf32>
    %441 = math.exp %440 : vector<2x128xf32>
    %cst_121 = arith.constant 1.000000e+00 : f32
    %442 = vector.broadcast %cst_121 : f32 to vector<2x128xf32>
    %443 = arith.addf %442, %441 : vector<2x128xf32>
    %444 = arith.divf %442, %443 : vector<2x128xf32>
    %445 = vector.extract_strided_slice %444 {offsets = [0, 0], sizes = [2, 64], strides = [1, 1]} : vector<2x128xf32> to vector<2x64xf32>
    %446 = vector.extract_strided_slice %444 {offsets = [0, 64], sizes = [2, 64], strides = [1, 1]} : vector<2x128xf32> to vector<2x64xf32>
    %447 = vector.extract_strided_slice %437 {offsets = [0, 128], sizes = [2, 64], strides = [1, 1]} : vector<2x192xf32> to vector<2x64xf32>
    %448 = arith.mulf %445, %447 : vector<2x64xf32>
    %449 = arith.addf %116, %448 : vector<2x64xf32>
    %450 = math.tanh %449 : vector<2x64xf32>
    %cst_122 = arith.constant 1.000000e+00 : f32
    %451 = vector.broadcast %cst_122 : f32 to vector<2x64xf32>
    %452 = arith.subf %451, %446 : vector<2x64xf32>
    %453 = arith.mulf %452, %450 : vector<2x64xf32>
    %454 = arith.mulf %446, %431 : vector<2x64xf32>
    %455 = arith.addf %453, %454 : vector<2x64xf32>
    %cst_123 = arith.constant 0.000000e+00 : f32
    %456 = vector.broadcast %cst_123 : f32 to vector<2x64xf32>
    %457 = arith.maximumf %455, %456 : vector<2x64xf32>
    %c26 = arith.constant 26 : index
    %c0_124 = arith.constant 0 : index
    %458 = vector.load %arg22[%c26, %c0_124] : memref<30x64xf32, #tpu.memory_space<vmem>>, vector<2x64xf32>
    tpu.vector_store %arg22[%c26, %c0_124], %457 {strides = array<i32>} : memref<30x64xf32, #tpu.memory_space<vmem>>, vector<2x64xf32>,
    %459 = arith.truncf %455 : vector<2x64xf32> to vector<2x64xbf16>
    %cst_125 = arith.constant dense<0.000000e+00> : vector<2x192xf32>
    %460 = tpu.matmul %459, %118, %cst_125 {dimension_numbers = #tpu.dot_dimension_numbers<[1], [0], [0], [1], [0, 0, 1, 1], [], []>} : vector<2x64xbf16>, vector<64x192xbf16>, vector<2x192xf32> -> vector<2x192xf32>
    %461 = arith.addf %460, %121 : vector<2x192xf32>
    %462 = vector.extract_strided_slice %461 {offsets = [0, 0], sizes = [2, 128], strides = [1, 1]} : vector<2x192xf32> to vector<2x128xf32>
    %463 = arith.addf %115, %462 : vector<2x128xf32>
    %464 = arith.negf %463 : vector<2x128xf32>
    %465 = math.exp %464 : vector<2x128xf32>
    %cst_126 = arith.constant 1.000000e+00 : f32
    %466 = vector.broadcast %cst_126 : f32 to vector<2x128xf32>
    %467 = arith.addf %466, %465 : vector<2x128xf32>
    %468 = arith.divf %466, %467 : vector<2x128xf32>
    %469 = vector.extract_strided_slice %468 {offsets = [0, 0], sizes = [2, 64], strides = [1, 1]} : vector<2x128xf32> to vector<2x64xf32>
    %470 = vector.extract_strided_slice %468 {offsets = [0, 64], sizes = [2, 64], strides = [1, 1]} : vector<2x128xf32> to vector<2x64xf32>
    %471 = vector.extract_strided_slice %461 {offsets = [0, 128], sizes = [2, 64], strides = [1, 1]} : vector<2x192xf32> to vector<2x64xf32>
    %472 = arith.mulf %469, %471 : vector<2x64xf32>
    %473 = arith.addf %116, %472 : vector<2x64xf32>
    %474 = math.tanh %473 : vector<2x64xf32>
    %cst_127 = arith.constant 1.000000e+00 : f32
    %475 = vector.broadcast %cst_127 : f32 to vector<2x64xf32>
    %476 = arith.subf %475, %470 : vector<2x64xf32>
    %477 = arith.mulf %476, %474 : vector<2x64xf32>
    %478 = arith.mulf %470, %455 : vector<2x64xf32>
    %479 = arith.addf %477, %478 : vector<2x64xf32>
    %cst_128 = arith.constant 0.000000e+00 : f32
    %480 = vector.broadcast %cst_128 : f32 to vector<2x64xf32>
    %481 = arith.maximumf %479, %480 : vector<2x64xf32>
    %c28 = arith.constant 28 : index
    %c0_129 = arith.constant 0 : index
    %482 = vector.load %arg22[%c28, %c0_129] : memref<30x64xf32, #tpu.memory_space<vmem>>, vector<2x64xf32>
    tpu.vector_store %arg22[%c28, %c0_129], %481 {strides = array<i32>} : memref<30x64xf32, #tpu.memory_space<vmem>>, vector<2x64xf32>,
    %c0_130 = arith.constant 0 : index
    %c0_131 = arith.constant 0 : index
    %483 = vector.load %arg22[%c0_130, %c0_131] : memref<30x64xf32, #tpu.memory_space<vmem>>, vector<30x64xf32>
    %c0_132 = arith.constant 0 : index
    %c0_133 = arith.constant 0 : index
    %484 = vector.load %arg18[%c0_132, %c0_133] : memref<64x128xf32, #tpu.memory_space<vmem>>, vector<64x128xf32>
    %cst_134 = arith.constant dense<0.000000e+00> : vector<30x128xf32>
    %485 = tpu.matmul %483, %484, %cst_134 {dimension_numbers = #tpu.dot_dimension_numbers<[1], [0], [0], [1], [0, 0, 1, 1], [], []>} : vector<30x64xf32>, vector<64x128xf32>, vector<30x128xf32> -> vector<30x128xf32>
    %c0_135 = arith.constant 0 : index
    %c0_136 = arith.constant 0 : index
    %486 = vector.load %arg19[%c0_135, %c0_136] : memref<1x128xf32, #tpu.memory_space<vmem>>, vector<1x128xf32>
    %487 = vector.broadcast %486 : vector<1x128xf32> to vector<30x128xf32>
    %488 = arith.addf %485, %487 : vector<30x128xf32>
    %c0_137 = arith.constant 0 : index
    %c0_138 = arith.constant 0 : index
    %489 = vector.load %arg20[%c0_137, %c0_138] : memref<30x128xf32, #tpu.memory_space<vmem>>, vector<30x128xf32>
    tpu.vector_store %arg20[%c0_137, %c0_138], %488 {strides = array<i32>} : memref<30x128xf32, #tpu.memory_space<vmem>>, vector<30x128xf32>,
    return
  }
}

</mosaic_0001>

<bundles_post_ra>
// kernel: grammar_vae_training_forward.1
= control target key start
LH: loop header
LB: loop body
LE: loop exit
PB: predicated region body
PF: predicated region fallthrough
CT: control target
= control target key end

     0   :  { %s3562_s0 = inlined_call_operand.vmem [shape: f32[30,12], index: 0, kind: input, shape index: {}]   ;;  %s3563_s1 = inlined_call_operand.vmem [shape: f32[24,2], index: 1, kind: input, shape index: {}]   ;;  %s3564_s2 = inlined_call_operand.vmem [shape: f32[1,2], index: 2, kind: input, shape index: {}]   ;;  %s3565_s3 = inlined_call_operand.vmem [shape: f32[6,3], index: 3, kind: input, shape index: {}]   ;;  %s3566_s4 = inlined_call_operand.vmem [shape: f32[1,3], index: 4, kind: input, shape index: {}]   ;;  %s3567_s5 = inlined_call_operand.vmem [shape: f32[12,4], index: 5, kind: input, shape index: {}]   ;;  %s3568_s6 = inlined_call_operand.vmem [shape: f32[1,4], index: 6, kind: input, shape index: {}]   ;;  %s3569_s7 = inlined_call_operand.hbm [shape: f32[36,50], index: 7, kind: input, shape index: {}]   ;;  %s3570_s8 = inlined_call_operand.vmem [shape: f32[1,50], index: 8, kind: input, shape index: {}]   ;;  %s3571_s9 = inlined_call_operand.hbm [shape: f32[50,100], index: 9, kind: input, shape index: {}]   ;;  %s3572_s10 = inlined_call_operand.vmem [shape: f32[1,100], index: 10, kind: input, shape index: {}]   ;;  %s3573_s11 = inlined_call_operand.vmem [shape: f32[2,50], index: 11, kind: input, shape index: {}]   ;;  %s3574_s12 = inlined_call_operand.hbm [shape: f32[50,50], index: 12, kind: input, shape index: {}]   ;;  %s3575_s13 = inlined_call_operand.vmem [shape: f32[1,50], index: 13, kind: input, shape index: {}]   ;;  %s3576_s14 = inlined_call_operand.vmem [shape: f32[50,192], index: 14, kind: input, shape index: {}]   ;;  %s3577_s15 = inlined_call_operand.vmem [shape: f32[1,192], index: 15, kind: input, shape index: {}]   ;;  %s3578_s16 = inlined_call_operand.vmem [shape: f32[64,192], index: 16, kind: input, shape index: {}]   ;;  %s3579_s17 = inlined_call_operand.vmem [shape: f32[1,192], index: 17, kind: input, shape index: {}]   ;;  %s3580_s18 = inlined_call_operand.hbm [shape: f32[64,128], index: 18, kind: input, shape index: {}]   ;;  %s3581_s19 = inlined_call_operand.vmem [shape: f32[1,128], index: 19, kind: input, shape index: {}]   ;;  %s3582_s20 = inlined_call_operand.vmem [shape: f32[30,128], index: 20, kind: output, shape index: {0}]   ;;  %s3583_s21 = inlined_call_operand.hbm [shape: f32[1,1], index: 21, kind: output, shape index: {1}]  }
   0x1   :  { %3587 = sst [smem:[#allocation16_spill]] %s3562_s0 }
   0x2   :  { %3588 = sst [smem:[#allocation17_spill]] %s3563_s1 }
   0x3   :  { %3589 = sst [smem:[#allocation18_spill]] %s3564_s2 }
   0x4   :  { %3590 = sst [smem:[#allocation19_spill]] %s3565_s3 }
   0x5   :  { %3591 = sst [smem:[#allocation20_spill]] %s3566_s4 }
   0x6   :  { %3592 = sst [smem:[#allocation21_spill]] %s3567_s5 }
   0x7   :  { %27 = vsyncpa [#allocation4], 0 }
   0x8   :  { %28 = vsyncpa [#allocation7], 0 }
   0x9   :  { %29 = vsyncpa [#allocation10], 0 }
   0xa   :  { %30 = vsyncpa [#allocation5], 0  ;;  %s2676_s2 = smov [#allocation6]   ;;  %s2677_s26 = smov [#allocation3]  }
   0xb   :  { %s64_s25 = sshll.u32 %s2676_s2, 4  ;;  %s50_s27 = sshll.u32 %s2677_s26, 4  ;;  %s65_s25 = int_to_ptr.vmem [resolvable:$true] %s64_s25  ;;  %s2811_s27 = int_to_ptr.vmem [resolvable:$true] %s50_s27 }
   0xc   :  { %s2558_s29 = scalar_lea.hbm %s3571_s9, 896 }
   0xd   :  { %p2559_p0 = scmp.ne.s32.totalorder %s3571_s9, %s2558_s29  ;;  %p2562_p1 = scmp.lt.u32.totalorder %s2558_s29, %s3571_s9 }
   0xf   :  { %p2564_p2 = pnand %p2562_p1, %p2559_p0 }
  0x11   :  { %2567 = shalt.err (!%p2564_p2)
}
  0x12   :  { %s2568_s22 = scalar_lea.vmem %s65_s25, 896  ;;  %p2573_p4 = scmp.lt.s32.totalorder %s65_s25, %s65_s25 }
  0x13   :  { %p2569_p3 = scmp.ne.s32.totalorder %s65_s25, %s2568_s22  ;;  %p2574_p5 = scmp.lt.s32.totalorder %s2568_s22, %s2568_s22 }
  0x15   :  { %p2575_p6 = por %p2574_p5, %p2573_p4 }
  0x17   :  { %p2576_p7 = pnand %p2575_p6, %p2569_p3 }
  0x19   :  { %2579 = shalt.err (!%p2576_p7)
}
  0x1a   :  { %s2678_s23 = smov 128   ;;  %s2679_s1 = smov 8  }
  0x1b   :  { %70 = dma.hbm_to_vmem [thread:$0]  %s3571_s9, 896, %s65_s25, [#allocation7], %s2678_s23, %s2678_s23, %s2679_s1  }
  0x1c   :  { %s2580_s28 = scalar_lea.hbm %s3569_s7, 640 }
  0x1d   :  { %p2581_p8 = scmp.ne.s32.totalorder %s3569_s7, %s2580_s28  ;;  %p2584_p9 = scmp.lt.u32.totalorder %s2580_s28, %s3569_s7 }
  0x1f   :  { %p2586_p10 = pnand %p2584_p9, %p2581_p8 }
  0x21   :  { %2589 = shalt.err (!%p2586_p10)
}
  0x22   :  { %s2590_s5 = scalar_lea.vmem %s2811_s27, 640  ;;  %p2595_p12 = scmp.lt.s32.totalorder %s2811_s27, %s2811_s27 }
  0x23   :  { %p2591_p11 = scmp.ne.s32.totalorder %s2811_s27, %s2590_s5  ;;  %p2596_p13 = scmp.lt.s32.totalorder %s2590_s5, %s2590_s5 }
  0x25   :  { %p2597_p0 = por %p2596_p13, %p2595_p12 }
  0x27   :  { %p2598_p1 = pnand %p2597_p0, %p2591_p11 }
  0x29   :  { %2601 = shalt.err (!%p2598_p1)
}
  0x2a   :  { %56 = dma.hbm_to_vmem [thread:$0]  %s3569_s7, 640, %s2811_s27, [#allocation4], %s2678_s23, %s2678_s23, %s2679_s1  }
  0x2b   :  { %s2680_s22 = smov [#allocation8]   ;;  %s2681_s2 = smov [#allocation9]  }
  0x2c   :  { %s80_s24 = sshll.u32 %s2680_s22, 4  ;;  %s102_s26 = sshll.u32 %s2681_s2, 4  ;;  %s81_s24 = int_to_ptr.vmem [resolvable:$true] %s80_s24  ;;  %s2848_s26 = int_to_ptr.vmem [resolvable:$true] %s102_s26 }
  0x2d   :  { %s2602_s29 = scalar_lea.hbm %s3574_s12, 896 }
  0x2e   :  { %p2603_p2 = scmp.ne.s32.totalorder %s3574_s12, %s2602_s29  ;;  %p2606_p3 = scmp.lt.u32.totalorder %s2602_s29, %s3574_s12 }
  0x30   :  { %p2608_p4 = pnand %p2606_p3, %p2603_p2 }
  0x32   :  { %2611 = shalt.err (!%p2608_p4)
}
  0x33   :  { %s2612_s7 = scalar_lea.vmem %s81_s24, 896  ;;  %p2617_p6 = scmp.lt.s32.totalorder %s81_s24, %s81_s24 }
  0x34   :  { %p2613_p5 = scmp.ne.s32.totalorder %s81_s24, %s2612_s7  ;;  %p2618_p7 = scmp.lt.s32.totalorder %s2612_s7, %s2612_s7 }
  0x36   :  { %p2619_p8 = por %p2618_p7, %p2617_p6 }
  0x38   :  { %p2620_p9 = pnand %p2619_p8, %p2613_p5 }
  0x3a   :  { %2623 = shalt.err (!%p2620_p9)
}
  0x3b   :  { %86 = dma.hbm_to_vmem [thread:$0]  %s3574_s12, 896, %s81_s24, [#allocation7], %s2678_s23, %s2678_s23, %s2679_s1  }
  0x3c   :  { %s2624_s2 = scalar_lea.hbm %s3580_s18, 1024 }
  0x3d   :  { %p2625_p10 = scmp.ne.s32.totalorder %s3580_s18, %s2624_s2  ;;  %p2628_p11 = scmp.lt.u32.totalorder %s2624_s2, %s3580_s18 }
  0x3f   :  { %p2630_p12 = pnand %p2628_p11, %p2625_p10 }
  0x41   :  { %2633 = shalt.err (!%p2630_p12)
}
  0x42   :  { %s2634_s4 = scalar_lea.vmem %s2848_s26, 1024  ;;  %p2639_p0 = scmp.lt.s32.totalorder %s2848_s26, %s2848_s26 }
  0x43   :  { %p2635_p13 = scmp.ne.s32.totalorder %s2848_s26, %s2634_s4  ;;  %p2640_p1 = scmp.lt.s32.totalorder %s2634_s4, %s2634_s4 }
  0x45   :  { %p2641_p2 = por %p2640_p1, %p2639_p0 }
  0x47   :  { %p2642_p3 = pnand %p2641_p2, %p2635_p13 }
  0x49   :  { %2645 = shalt.err (!%p2642_p3)
}
  0x4a   :  { %108 = dma.hbm_to_vmem [thread:$0]  %s3580_s18, 1024, %s2848_s26, [#allocation10], %s2678_s23, %s2678_s23, %s2679_s1  }
  0x4b   :  { %2668 = dma.done.wait [#allocation4], 640  }
  0x4c   :  { %2669 = vsyncadd [#allocation4], 4294966656 }
  0x4d   :  { %2670 = dma.done.wait [#allocation7], 1792  }
  0x4e   :  { %2671 = vsyncadd [#allocation7], 4294965504 }
  0x4f   :  { %2672 = dma.done.wait [#allocation10], 1024  }
  0x50   :  { %2673 = vsyncadd [#allocation10], 4294966272  ;;  %s3593_s7 = sld [smem:[#allocation16_spill]]  ;;  %s3594_s3 = sld [smem:[#allocation17_spill]]  ;;  %vm172_vm0 = vcmask 1043456   ;;  %vm154_vm2 = vcmask 97280  }
  0x51   :  { %vm134_vm1 = vsmask.f32 7424  ;;  %s2682_s12 = smov 12   ;;  %vm167_vm3 = vcmask 195584   ;;  %s3595_s5 = sld [smem:[#allocation18_spill]]  ;;  %vm284_vm4 = vcmask 1042432  }
  0x52   :  { %s3596_s9 = sld [smem:[#allocation19_spill]]  ;;  %vm254_vm5 = vcmask 1046528   ;;  %s2683_s25 = smov 4   ;;  %vm267_vm6 = vcmask 31744   ;;  %vm262_vm7 = vcmask 15360   ;;  %vm279_vm8 = vcmask 48128  }
  0x53   :  { %s2684_s22 = smov 2   ;;  %s3597_s23 = sld [smem:[#allocation20_spill]]  ;;  %vm411_vm9 = vcmask 1045504   ;;  %vm374_vm10 = vsmask.f32 6400  ;;  %vm386_vm11 = vcmask 23552  }
  0x54   :  { %s3598_s28 = sld [smem:[#allocation21_spill]]  ;;  %s2685_s4 = smov 6   ;;  %vm395_vm12 = vcmask 72704   ;;  %vm516_vm13 = vcmask 1044480   ;;  %vm506_vm14 = vsmask.f32 5376 }
  0x55   :  { %s2686_s24 = smov 3   ;;  %s2687_s30 = smov 9   ;;  %vm586_vm15 = vcmask 1041408  }
  0x56   :  { %v124_v0 = vld [vmem:[%s3593_s7] sm:$0xff]  ;;  %v125_v1 = vld [vmem:[%s3593_s7 + $0x8] sm:$0xff]  ;;  %v126_v2 = vld [vmem:[%s3593_s7 + $0x10] sm:$0xff]  ;;  %s2694_s27 = smov 20  }
  0x57   :  { %v127_v3 = vld [vmem:[%s3593_s7 + $0x18] sm:$0x3f]  ;;  %v132_v4 = vpack.c.bf16 %v125_v1, %v124_v0  ;;  %v128_v5 = vld [vmem:[%s3594_s3] sm:$0xff]  ;;  %v129_v6 = vld [vmem:[%s3594_s3 + $0x8] sm:$0xff] }
  0x58   :  { %v133_v7 = vpack.c.bf16 %v127_v3, %v126_v2  ;;  %v159_v8 = vpack.c.bf16 %v129_v6, %v128_v5  ;;  %v130_v9 = vld [vmem:[%s3594_s3 + $0x10] sm:$0xff]  ;;  %v2215_v25 = vld [vmem:[%s3595_s5] ss:$0 sm:$0xff] }
  0x59   :  { %v136_v10 = vshrl.u32 %v132_v4, 16  ;;  %v138_v11 = vshll.u32 %v132_v4, 16  ;;  %v160_v12 = vpack.c.bf16 %v130_v9, %v130_v9  ;;  %v229_v34 = vld [vmem:[%s3596_s9] sm:$0x3f]  ;;  %s2695_s9 = smov 28  }
  0x5a   :  { %v143_v13 = vshll.u32 %v133_v7, 16  ;;  %2310 = vmatprep.subr.bf16.mxu0 %v159_v8  ;;  %v147_v16 = vshrl.u32 %v133_v7, 16  ;;  %v272_v37 = vpack.c.bf16 %v229_v34, %v229_v34  ;;  %v2218_v63 = vld [vmem:[%s3597_s23] ss:$0 sm:$0xff]  ;;  %v342_v1 = vld [vmem:[%s3598_s28 + $0x8] sm:$0xf] }
  0x5b   :  { %v140_v14 = vrot.slane %v138_v11, 1  ;;  %2311 = vmatpush3.bf16.msra.mxu0 %v159_v8  ;;  %v174_v17 = vsel %vm172_vm0, %v160_v12, 0  ;;  %v341_v0 = vld [vmem:[%s3598_s28] sm:$0xff] }
  0x5c   :  { %v145_v15 = vrot.slane %v143_v13, 1  ;;  %2430 = vmatprep.subr.msk.bf16.mxu0 %vm172_vm0, %v160_v12  ;;  %2431 = vmatprep.subr.msk.bf16.mxu1 %vm284_vm4, %v272_v37  ;;  %v286_v41 = vsel %vm284_vm4, %v272_v37, 0  ;;  %v400_v3 = vpack.c.bf16 %v342_v1, %v341_v0  ;;  %vm522_vm4 = vsmask.f32 4352 }
  0x5d   :  { %v141_v18 = vor.u32 %v140_v14, %v136_v10  ;;  %2319 = vmatpush3.bf16.msra.mxu1 %v286_v41 }
  0x5e   :  { %v149_v20 = vor.u32 %v147_v16, %v145_v15  ;;  %2432 = vmatprep.subr.msk.bf16.mxu1 %vm411_vm9, %v400_v3  ;;  %v413_v8 = vsel %vm411_vm9, %v400_v3, 0 }
  0x5f   :  { %v146_v19 = vsel %vm134_vm1, %v141_v18, %v145_v15  ;;  %2313 = vmatpush3.bf16.msra.mxu0 %v174_v17 }
  0x60   :  { %150 = vrot.lane.b32.xlu0 %v146_v19, %s2682_s12 }
  0x64   :  { %152 = vrot.lane.b32.xlu0 %v149_v20, %s2682_s12 }
  0xd2   :  { %v151_v21 = vpop.permute.xlu0 %150 }
  0xd3   :  { %v156_v22 = vsel %vm154_vm2, %v132_v4, %v151_v21 }
  0xd4   :  { %2314 = vmatprep.mubr.msk.bf16.mxu0 %vm167_vm3, %v156_v22 }
  0xd6   :  { %v153_v23 = vpop.permute.xlu0 %152 }
  0xd7   :  { %v158_v24 = vsel %vm154_vm2, %v133_v7, %v153_v23 }
  0xd8   :  { %2315 = vmatmul.mubr.msk.bf16.vlgmr.msra.gmra.mrb[0].mxu0 %vm167_vm3, %v158_v24 }
 0x1ab   :  { %v2316_v26 = vpop.f32.mrb[0].mxu0 }
 0x1ac   :  { %v219_v27 = vadd.f32 %v2316_v26, %v2215_v25  ;;  %v210_v28 = vpop.f32.mrb[1].mxu0 }
 0x1ad   :  { %v211_v29 = vadd.f32 %v2215_v25, %v210_v28  ;;  %v2317_v30 = vpop.f32.mrb[2].mxu0 }
 0x1ae   :  { %v222_v31 = vadd.f32 %v2317_v30, %v2215_v25  ;;  %v213_v32 = vpop.f32.mrb[3].mxu0  ;;  %v227_v35 = vmax.f32 %v219_v27, 0.0 }
 0x1af   :  { %v214_v33 = vadd.f32 %v2215_v25, %v213_v32  ;;  %v225_v38 = vmax.f32 %v211_v29, 0.0 }
 0x1b0   :  { %v228_v36 = vmax.f32 %v222_v31, 0.0 }
 0x1b1   :  { %v226_v39 = vmax.f32 %v214_v33, 0.0 }
 0x1b2   :  { %v232_v40 = vpack.c.bf16 %v228_v36, %v227_v35 }
 0x1b3   :  { %v231_v42 = vpack.c.bf16 %v226_v39, %v225_v38 }
 0x1b4   :  { %v256_v43 = vrot.slane %v232_v40, 1  ;;  %v241_v44 = vshll.u32 %v232_v40, 16  ;;  %v245_v48 = vshrl.u32 %v232_v40, 16 }
 0x1b5   :  { %v255_v45 = vrot.slane %v231_v42, 1  ;;  %v236_v46 = vshll.u32 %v231_v42, 16  ;;  %v234_v50 = vshrl.u32 %v231_v42, 16 }
 0x1b6   :  { %v243_v47 = vrot.slane %v241_v44, 1 }
 0x1b7   :  { %v257_v49 = vsel %vm254_vm5, %v255_v45, %v256_v43  ;;  %v238_v51 = vrot.slane %v236_v46, 1 }
 0x1b8   :  { %258 = vrot.lane.b32.xlu0 %v257_v49, %s2683_s25  ;;  %v247_v52 = vor.u32 %v245_v48, %v243_v47  ;;  %v2221_v49 = vld [vmem:[%s3568_s6] ss:$0 sm:$0xff]  ;;  %s2688_s6 = smov 16  }
 0x1b9   :  { %v239_v53 = vor.u32 %v238_v51, %v234_v50 }
 0x1ba   :  { %250 = vrot.lane.b32.xlu1 %v247_v52, %s2684_s22 }
 0x1bb   :  { %v244_v54 = vsel %vm134_vm1, %v239_v53, %v243_v47 }
 0x1be   :  { %248 = vrot.lane.b32.xlu1 %v244_v54, %s2684_s22 }
 0x1c2   :  { %260 = vrot.lane.b32.xlu1 %v256_v43, %s2683_s25 }
 0x22a   :  { %v259_v57 = vpop.permute.xlu0 %258 }
 0x22c   :  { %v251_v55 = vpop.permute.xlu1 %250 }
 0x22d   :  { %v266_v60 = vsel %vm262_vm7, %v232_v40, %v251_v55 }
 0x230   :  { %v249_v56 = vpop.permute.xlu1 %248 }
 0x231   :  { %v264_v58 = vsel %vm262_vm7, %v231_v42, %v249_v56  ;;  %vm548_vm7 = vcmask 162816  }
 0x232   :  { %v269_v59 = vsel %vm267_vm6, %v264_v58, %v259_v57 }
 0x233   :  { %2320 = vmatprep.mubr.msk.bf16.mxu1 %vm279_vm8, %v269_v59 }
 0x234   :  { %v261_v61 = vpop.permute.xlu1 %260 }
 0x235   :  { %v271_v62 = vsel %vm267_vm6, %v266_v60, %v261_v61 }
 0x236   :  { %2321 = vmatmul.mubr.msk.bf16.vlgmr.msra.gmra.mrb[0].mxu1 %vm279_vm8, %v271_v62 }
 0x237   :  { %2325 = vmatpush3.bf16.msra.mxu1 %v413_v8 }
 0x309   :  { %v2322_v2 = vpop.f32.mrb[0].mxu1 }
 0x30a   :  { %v331_v4 = vadd.f32 %v2322_v2, %v2218_v63  ;;  %v322_v5 = vpop.f32.mrb[1].mxu1 }
 0x30b   :  { %v323_v6 = vadd.f32 %v2218_v63, %v322_v5  ;;  %v2323_v7 = vpop.f32.mrb[2].mxu1 }
 0x30c   :  { %v334_v9 = vadd.f32 %v2323_v7, %v2218_v63  ;;  %v325_v10 = vpop.f32.mrb[3].mxu1  ;;  %v339_v12 = vmax.f32 %v331_v4, 0.0 }
 0x30d   :  { %v326_v11 = vadd.f32 %v2218_v63, %v325_v10  ;;  %v337_v14 = vmax.f32 %v323_v6, 0.0  ;;  %v567_v10 = vld [vmem:[#allocation3] sm:$0xff] }
 0x30e   :  { %v340_v13 = vmax.f32 %v334_v9, 0.0 }
 0x30f   :  { %v338_v15 = vmax.f32 %v326_v11, 0.0  ;;  %v568_v11 = vld [vmem:[#allocation3 + $0x8] sm:$0xff] }
 0x310   :  { %v345_v16 = vpack.c.bf16 %v340_v13, %v339_v12 }
 0x311   :  { %v344_v17 = vpack.c.bf16 %v338_v15, %v337_v14 }
 0x312   :  { %v368_v18 = vrot.slane %v345_v16, 1  ;;  %v354_v19 = vshll.u32 %v345_v16, 16  ;;  %v358_v20 = vshrl.u32 %v345_v16, 16 }
 0x313   :  { %v367_v21 = vrot.slane %v344_v17, 1  ;;  %v347_v22 = vshrl.u32 %v344_v17, 16  ;;  %v349_v23 = vshll.u32 %v344_v17, 16 }
 0x314   :  { %372 = vrot.lane.b32.xlu1 %v368_v18, %s2685_s4  ;;  %v356_v24 = vrot.slane %v354_v19, 1  ;;  %v378_v25 = vrot.slane %v358_v20, 1  ;;  %v379_v26 = vrot.slane %v354_v19, 2 }
 0x315   :  { %v369_v27 = vsel %vm254_vm5, %v367_v21, %v368_v18  ;;  %v351_v28 = vrot.slane %v349_v23, 1  ;;  %v375_v29 = vrot.slane %v347_v22, 1  ;;  %v376_v30 = vrot.slane %v349_v23, 2  ;;  %v569_v23 = vld [vmem:[#allocation3 + $0x10] sm:$0xff] }
 0x316   :  { %370 = vrot.lane.b32.xlu0 %v369_v27, %s2685_s4  ;;  %v360_v31 = vor.u32 %v358_v20, %v356_v24  ;;  %v380_v34 = vor.u32 %v379_v26, %v378_v25  ;;  %s2700_s4 = smov [#allocation11]  }
 0x317   :  { %v352_v32 = vor.u32 %v351_v28, %v347_v22  ;;  %v377_v35 = vor.u32 %v376_v30, %v375_v29  ;;  %v572_v22 = vpack.c.bf16 %v568_v11, %v567_v10  ;;  %v2689_v30 = vmov 0.0  }
 0x318   :  { %363 = vrot.lane.b32.xlu1 %v360_v31, %s2686_s24  ;;  %2330 = vmatprep.subr.bf16.mxu0 %v2689_v30  ;;  %v571_v31 = vld [vmem:[#allocation3 + $0x20] sm:$0xf] }
 0x319   :  { %v357_v33 = vsel %vm134_vm1, %v352_v32, %v356_v24  ;;  %v381_v36 = vsel %vm374_vm10, %v377_v35, %v380_v34  ;;  %v570_v24 = vld [vmem:[#allocation3 + $0x18] sm:$0xff]  ;;  %2331 = vmatpush3.bf16.msra.mxu0 %v572_v22  ;;  %v784_v22 = vld [vmem:[#allocation8 + $0x8] sm:$0xff] }
 0x31a   :  { %361 = vrot.lane.b32.xlu0 %v357_v33, %s2686_s24  ;;  %v573_v35 = vpack.c.bf16 %v570_v24, %v569_v23  ;;  %2332 = vmatprep.subr.bf16.mxu0 %v2689_v30  ;;  %v785_v23 = vld [vmem:[#allocation8 + $0x10] sm:$0xff]  ;;  %s2202_s24 = sshll.u32 %s2700_s4, 4  ;;  %s2203_s24 = int_to_ptr.vmem [resolvable:$true] %s2202_s24 }
 0x31b   :  { %s2646_s5 = scalar_lea.vmem %s2203_s24, 16  ;;  %s2650_s7 = scalar_lea.vmem %s2203_s24, 32 }
 0x31c   :  { %384 = vrot.lane.b32.xlu1 %v380_v34, %s2687_s30  ;;  %p2647_p4 = scmp.ne.s32.totalorder %s2203_s24, %s2646_s5  ;;  %p2651_p5 = scmp.lt.s32.totalorder %s2203_s24, %s2203_s24 }
 0x31d   :  { %2333 = vmatpush3.bf16.msra.mxu0 %v573_v35  ;;  %p2652_p6 = scmp.lt.s32.totalorder %s2650_s7, %s2646_s5 }
 0x31e   :  { %382 = vrot.lane.b32.xlu0 %v381_v36, %s2687_s30  ;;  %2334 = vmatprep.subr.bf16.mxu0 %v2689_v30 }
 0x31f   :  { %p2653_p7 = por %p2652_p6, %p2651_p5 }
 0x321   :  { %p2654_p8 = pnand %p2653_p7, %p2647_p4 }
 0x386   :  { %v373_v37 = vpop.permute.xlu1 %372 }
 0x388   :  { %v371_v38 = vpop.permute.xlu0 %370 }
 0x38a   :  { %v364_v39 = vpop.permute.xlu1 %363 }
 0x38b   :  { %v390_v42 = vsel %vm386_vm11, %v345_v16, %v364_v39 }
 0x38c   :  { %v362_v40 = vpop.permute.xlu0 %361  ;;  %v394_v46 = vsel %vm279_vm8, %v390_v42, %v373_v37 }
 0x38d   :  { %v388_v41 = vsel %vm386_vm11, %v344_v17, %v362_v40  ;;  %v631_v40 = vld [vmem:[#allocation6] sm:$0xff]  ;;  %vm564_vm11 = vsmask.f32 256 }
 0x38e   :  { %v385_v43 = vpop.permute.xlu1 %384  ;;  %v392_v44 = vsel %vm279_vm8, %v388_v41, %v371_v38  ;;  %v574_v38 = vpack.c.bf16 %v571_v31, %v571_v31  ;;  %v632_v41 = vld [vmem:[#allocation6 + $0x8] sm:$0xff]  ;;  %vm553_vm8 = vcmask 228352   ;;  %v2226_v31 = vld [vmem:[%s3572_s10] ss:$0 sm:$0xff] }
 0x38f   :  { %v399_v48 = vsel %vm395_vm12, %v394_v46, %v385_v43  ;;  %v2397_v46 = vpack.c.bf16 %v632_v41, %v631_v40 }
 0x390   :  { %v383_v45 = vpop.permute.xlu0 %382 }
 0x391   :  { %v397_v47 = vsel %vm395_vm12, %v392_v44, %v383_v45  ;;  %v2692_v45 = vmov 0.0|0.0  }
 0x392   :  { %2326 = vmatprep.mubr.msk.bf16.mxu1 %vm154_vm2, %v397_v47  ;;  %2396 = vmatprep.subr.bf16.mxu1 %v2692_v45  ;;  %v633_v47 = vld [vmem:[#allocation6 + $0x10] sm:$0xff] }
 0x393   :  { %2327 = vmatmul.mubr.msk.bf16.vlgmr.msra.gmra.mrb[4].mxu1 %vm154_vm2, %v399_v48  ;;  %v634_v48 = vld [vmem:[#allocation6 + $0x18] sm:$0xff] }
 0x394   :  { %2398 = vmatpush3.bf16.msra.mxu1 %v2397_v46 }
 0x395   :  { %2399 = vmatprep.subr.bf16.mxu1 %v2692_v45 }
 0x466   :  { %v2328_v50 = vpop.f32.mrb[4].mxu1 }
 0x467   :  { %v458_v51 = vadd.f32 %v2328_v50, %v2221_v49  ;;  %v449_v52 = vpop.f32.mrb[5].mxu1 }
 0x468   :  { %v450_v53 = vadd.f32 %v2221_v49, %v449_v52  ;;  %v2329_v54 = vpop.f32.mrb[6].mxu1  ;;  %v588_v52 = vsel %vm586_vm15, %v574_v38, 0 }
 0x469   :  { %v465_v55 = vmax.f32 %v458_v51, 0.0  ;;  %v452_v56 = vpop.f32.mrb[7].mxu1  ;;  %v635_v54 = vld [vmem:[#allocation6 + $0x20] sm:$0xff]  ;;  %2335 = vmatpush3.bf16.msra.mxu0 %v588_v52 }
 0x46a   :  { %v453_v57 = vadd.f32 %v2221_v49, %v452_v56  ;;  %v463_v59 = vmax.f32 %v450_v53, 0.0  ;;  %v2400_v53 = vpack.c.bf16 %v634_v48, %v633_v47  ;;  %2405 = vmatprep.subr.bf16.mxu0 %v2692_v45 }
 0x46b   :  { %v2950_v58 = vpack.c.bf16 %v465_v55, %v465_v55  ;;  %v636_v55 = vld [vmem:[#allocation6 + $0x28] sm:$0xff] }
 0x46c   :  { %v464_v60 = vmax.f32 %v453_v57, 0.0  ;;  %2401 = vmatpush3.bf16.msra.mxu1 %v2400_v53  ;;  %v876_v53 = vld [vmem:[%s3576_s14 + $0x8] sm:$0xff] }
 0x46d   :  { %v485_v62 = vrot.slane %v2950_v58, 1  ;;  %v2956_v63 = vshll.u32 %v2950_v58, 16  ;;  %v2966_v3 = vshrl.u32 %v2950_v58, 16  ;;  %v502_v8 = vrot.slane %v2950_v58, 2  ;;  %2402 = vmatprep.subr.bf16.mxu1 %v2692_v45 }
 0x46e   :  { %v2952_v61 = vpack.c.bf16 %v464_v60, %v463_v59  ;;  %v518_v25 = vrot.slane %v2950_v58, 3  ;;  %v534_v39 = vrot.slane %v2950_v58, 4  ;;  %v2403_v58 = vpack.c.bf16 %v636_v55, %v635_v54  ;;  %v878_v54 = vld [vmem:[%s3576_s14 + $0x18] sm:$0xff] }
 0x46f   :  { %v478_v13 = vrot.slane %v2956_v63, 1  ;;  %v494_v14 = vrot.slane %v2966_v3, 1  ;;  %v495_v15 = vrot.slane %v2956_v63, 2  ;;  %v510_v28 = vrot.slane %v2966_v3, 2 }
 0x470   :  { %v484_v0 = vrot.slane %v2952_v61, 1  ;;  %v2960_v1 = vshrl.u32 %v2952_v61, 16  ;;  %v2963_v2 = vshll.u32 %v2952_v61, 16  ;;  %v501_v4 = vrot.slane %v2952_v61, 2  ;;  %2404 = vmatpush3.bf16.msra.mxu1 %v2403_v58 }
 0x471   :  { %v517_v17 = vrot.slane %v2952_v61, 3  ;;  %v496_v26 = vor.u32 %v495_v15, %v494_v14  ;;  %v533_v27 = vrot.slane %v2952_v61, 4  ;;  %v511_v29 = vrot.slane %v2956_v63, 3  ;;  %2352 = vmatprep.subr.mxu1 %v2689_v30  ;;  %v2224_v14 = vld [vmem:[%s3570_s8] ss:$0 sm:$0xff]  ;;  %s2696_s8 = smov 78  }
 0x472   :  { %v486_v5 = vsel %vm254_vm5, %v484_v0, %v485_v62  ;;  %v473_v6 = vrot.slane %v2963_v2, 1  ;;  %v489_v7 = vrot.slane %v2960_v1, 1  ;;  %v490_v9 = vrot.slane %v2963_v2, 2 }
 0x473   :  { %487 = vrot.lane.b32.xlu1 %v486_v5, %s2679_s1  ;;  %v503_v16 = vsel %vm411_vm9, %v501_v4, %v502_v8  ;;  %v507_v18 = vrot.slane %v2960_v1, 2  ;;  %v508_v19 = vrot.slane %v2963_v2, 3  ;;  %v519_v32 = vsel %vm516_vm13, %v517_v17, %v518_v25  ;;  %s2690_s1 = smov 24   ;;  %v786_v25 = vld [vmem:[#allocation8 + $0x18] sm:$0xff] }
 0x474   :  { %v474_v12 = vor.u32 %v473_v6, %v2960_v1  ;;  %v491_v21 = vor.u32 %v490_v9, %v489_v7  ;;  %v523_v33 = vrot.slane %v2960_v1, 3  ;;  %v524_v34 = vrot.slane %v2963_v2, 4 }
 0x475   :  { %v509_v37 = vor.u32 %v508_v19, %v507_v18  ;;  %v512_v42 = vor.u32 %v511_v29, %v510_v28  ;;  %v526_v43 = vrot.slane %v2966_v3, 3  ;;  %v527_v44 = vrot.slane %v2956_v63, 4  ;;  %v788_v28 = vld [vmem:[#allocation8 + $0x28] sm:$0xff] }
 0x476   :  { %v479_v20 = vsel %vm134_vm1, %v474_v12, %v478_v13  ;;  %v497_v36 = vsel %vm374_vm10, %v491_v21, %v496_v26  ;;  %vm2691_vm1 = vmmov 0   ;;  %v535_v49 = vsel %vm172_vm0, %v533_v27, %v534_v39  ;;  %v637_v13 = vld [vmem:[#allocation6 + $0x30] sm:$0x3]  ;;  %v783_v21 = vld [vmem:[#allocation8] sm:$0xff] }
 0x477   :  { %504 = vrot.lane.b32.xlu1 %v503_v16, %s2688_s6  ;;  %480 = vrot.lane.b32.xlu0 %v479_v20, %s2683_s25  ;;  %v513_v50 = vsel %vm506_vm14, %v509_v37, %v512_v42  ;;  %v525_v51 = vor.u32 %v524_v34, %v523_v33  ;;  %v528_v56 = vor.u32 %v527_v44, %v526_v43  ;;  %vm540_vm0 = vcmask 64512   ;;  %v787_v27 = vld [vmem:[#allocation8 + $0x20] sm:$0xff] }
 0x478   :  { %2336 = vmatprep.mubr.msk.bf16.mxu0 %vm2691_vm1, %v2689_v30  ;;  %2354 = vmatprep.mubr.msk.f32.mxu1 %vm2691_vm1, %v2689_v30  ;;  %vm545_vm5 = vcmask 130048   ;;  %vm556_vm9 = vcmask 261120   ;;  %vm563_vm10 = vcmask 1040384   ;;  %v2406_v24 = vpack.c.bf16 %v784_v22, %v783_v21  ;;  %v969_v21 = vld [vmem:[%s3578_s16 + $0x48] sm:$0xff]  ;;  %v971_v22 = vld [vmem:[%s3578_s16 + $0x58] sm:$0xff] }
 0x479   :  { %v529_v57 = vsel %vm522_vm4, %v525_v51, %v528_v56  ;;  %2353 = vmatpush3.msk.msra.mxu1 %vm586_vm15, %v637_v13  ;;  %v2409_v26 = vpack.c.bf16 %v786_v25, %v785_v23  ;;  %v2412_v29 = vpack.c.bf16 %v788_v28, %v787_v27  ;;  %v963_v51 = vld [vmem:[%s3578_s16 + $0x18] sm:$0xff]  ;;  %v890_v55 = vpack.c.bf16 %v878_v54, %v876_v53  ;;  %v875_v56 = vld [vmem:[%s3576_s14] sm:$0xff]  ;;  %v965_v13 = vld [vmem:[%s3578_s16 + $0x28] sm:$0xff] }
 0x47a   :  { %v968_v25 = vld [vmem:[%s3578_s16 + $0x40] sm:$0xff]  ;;  %vm1064_vm4 = vcmask 517120  }
 0x47b   :  { %520 = vrot.lane.b32.xlu1 %v519_v32, %s2690_s1  ;;  %498 = vrot.lane.b32.xlu0 %v497_v36, %s2682_s12  ;;  %s2693_s12 = smov 32   ;;  %v883_v28 = vld [vmem:[%s3576_s14 + $0x40] sm:$0xff] }
 0x47c   :  { %919 = vmatprep.subr.bf16.mxu1 %v890_v55 }
 0x47f   :  { %536 = vrot.lane.b32.xlu1 %v535_v49, %s2693_s12  ;;  %514 = vrot.lane.b32.xlu0 %v513_v50, %s2694_s27  ;;  %v789_v49 = vld [vmem:[#allocation8 + $0x30] sm:$0x3]  ;;  %v961_v50 = vld [vmem:[%s3578_s16 + $0x8] sm:$0xff] }
 0x480   :  { %v3047_v52 = vpack.c.bf16 %v963_v51, %v961_v50 }
 0x483   :  { %530 = vrot.lane.b32.xlu0 %v529_v57, %s2695_s9  ;;  %v877_v57 = vld [vmem:[%s3576_s14 + $0x10] sm:$0xff] }
 0x484   :  { %v889_v58 = vpack.c.bf16 %v877_v57, %v875_v56  ;;  %v899_v56 = vlaneseq }
 0x486   :  { %v900_v57 = vshrl.u32 %v899_v56, 7 }
 0x4e5   :  { %v488_v59 = vpop.permute.xlu1 %487 }
 0x4e9   :  { %v481_v60 = vpop.permute.xlu0 %480  ;;  %v505_v62 = vpop.permute.xlu1 %504 }
 0x4ea   :  { %v539_v63 = vsel %vm267_vm6, %v2952_v61, %v481_v60  ;;  %vm565_vm6 = vmand %vm563_vm10, %vm564_vm11 }
 0x4eb   :  { %v542_v0 = vsel %vm540_vm0, %v539_v63, %v488_v59  ;;  %v882_v63 = vld [vmem:[%s3576_s14 + $0x38] sm:$0xff]  ;;  %vm754_vm0 = vcmask 402432  }
 0x4ed   :  { %v499_v1 = vpop.permute.xlu0 %498  ;;  %v521_v3 = vpop.permute.xlu1 %520 }
 0x4ee   :  { %v544_v2 = vsel %vm154_vm2, %v542_v0, %v499_v1  ;;  %vm582_vm2 = vcmask 293888   ;;  %v879_v0 = vld [vmem:[%s3576_s14 + $0x20] sm:$0xff] }
 0x4ef   :  { %v547_v4 = vsel %vm545_vm5, %v544_v2, %v505_v62  ;;  %v880_v62 = vld [vmem:[%s3576_s14 + $0x28] sm:$0xff]  ;;  %vm767_vm5 = vcmask 0  }
 0x4f0   :  { %v892_v2 = vpack.c.bf16 %v882_v63, %v880_v62 }
 0x4f1   :  { %v515_v5 = vpop.permute.xlu0 %514  ;;  %v537_v9 = vpop.permute.xlu1 %536 }
 0x4f2   :  { %v550_v6 = vsel %vm548_vm7, %v547_v4, %v515_v5 }
 0x4f3   :  { %v552_v7 = vsel %vm167_vm3, %v550_v6, %v521_v3  ;;  %vm645_vm3 = vcmask 408576   ;;  %v881_v3 = vld [vmem:[%s3576_s14 + $0x30] sm:$0xff] }
 0x4f4   :  { %v891_v5 = vpack.c.bf16 %v881_v3, %v879_v0 }
 0x4f5   :  { %v531_v8 = vpop.permute.xlu0 %530 }
 0x4f6   :  { %v555_v61 = vsel %vm553_vm8, %v552_v7, %v531_v8  ;;  %v884_v7 = vld [vmem:[%s3576_s14 + $0x48] sm:$0xff]  ;;  %v886_v8 = vld [vmem:[%s3576_s14 + $0x58] sm:$0xff] }
 0x4f7   :  { %v558_v10 = vsel %vm556_vm9, %v555_v61, %v537_v9  ;;  %v894_v9 = vpack.c.bf16 %v886_v8, %v884_v7  ;;  %v769_v61 = vld [vmem:[%s3573_s11] sm:$0x3] }
 0x4f8   :  { %v561_v11 = vrot.slane %v558_v10, 7 }
 0x4fa   :  { %v566_v12 = vsel %vm565_vm6, %v558_v10, %v561_v11  ;;  %v960_v10 = vld [vmem:[%s3578_s16] sm:$0xff]  ;;  %v962_v11 = vld [vmem:[%s3578_s16 + $0x10] sm:$0xff] }
 0x4fb   :  { %2337 = vmatmul.mubr.msk.bf16.vlgmr.msra.gmra.mrb[4].mxu0 %vm582_vm2, %v566_v12 }
 0x4fc   :  { %2371 = vmatprep.mubr.msk.f32.mxu0 %vm2691_vm1, %v2689_v30  ;;  %2407 = vmatpush3.bf16.msra.mxu0 %v2406_v24  ;;  %v3123_v24 = vpack.c.bf16 %v971_v22, %v969_v21  ;;  %vm996_vm1 = vcmask 523264  }
 0x4fd   :  { %2408 = vmatprep.subr.bf16.mxu0 %v2692_v45 }
 0x500   :  { %2410 = vmatpush3.bf16.msra.mxu0 %v2409_v26  ;;  %v970_v26 = vld [vmem:[%s3578_s16 + $0x50] sm:$0xff] }
 0x501   :  { %2411 = vmatprep.subr.bf16.mxu0 %v2692_v45  ;;  %v3132_v27 = vpack.c.bf16 %v970_v26, %v968_v25 }
 0x504   :  { %2413 = vmatpush3.bf16.msra.mxu0 %v2412_v29  ;;  %v885_v29 = vld [vmem:[%s3576_s14 + $0x50] sm:$0xff] }
 0x505   :  { %2369 = vmatprep.subr.mxu0 %v2689_v30 }
 0x508   :  { %2370 = vmatpush3.msk.msra.mxu0 %vm586_vm15, %v789_v49 }
 0x509   :  { %1000 = vmatprep.subr.bf16.mxu0 %v3047_v52 }
 0x5ce   :  { %v624_v15 = vpop.f32.mrb[4].mxu0 }
 0x5cf   :  { %v625_v16 = vadd.f32 %v2224_v14, %v624_v15  ;;  %v2338_v17 = vpop.f32.mrb[5].mxu0  ;;  %v967_v14 = vld [vmem:[%s3578_s16 + $0x38] sm:$0xff] }
 0x5d0   :  { %v627_v18 = vpop.f32.mrb[6].mxu0 }
 0x5d1   :  { %v630_v19 = vmax.f32 %v625_v16, 0.0  ;;  %v2339_v20 = vpop.f32.mrb[7].mxu0  ;;  %v3101_v16 = vpack.c.bf16 %v962_v11, %v960_v10  ;;  %v3104_v18 = vpack.c.bf16 %v967_v14, %v965_v13 }
 0x5d2   :  { %v966_v20 = vld [vmem:[%s3578_s16 + $0x30] sm:$0xff] }
 0x5d3   :  { %2355 = vmatmul.mubr.msk.f32.vlgmr.msra.gmra.mrb[8].mxu1 %vm645_vm3, %v630_v19  ;;  %v964_v19 = vld [vmem:[%s3578_s16 + $0x20] sm:$0xff] }
 0x5d4   :  { %920 = vmatpush1.bf16.msra.mxu1 %v889_v58  ;;  %v3120_v23 = vpack.c.bf16 %v966_v20, %v964_v19  ;;  %v901_v58 = vsub.s32 0, %v900_v57 }
 0x5d5   :  { %921 = vmatprep.subr.bf16.mxu1 %v892_v2 }
 0x5d8   :  { %922 = vmatpush1.bf16.msra.mxu1 %v891_v5 }
 0x5d9   :  { %923 = vmatprep.subr.bf16.mxu1 %v894_v9 }
 0x6a6   :  { %v718_v32 = vpop.f32.mrb[8].mxu1 }
 0x6a7   :  { %v3030_v33 = vadd.f32 %v2226_v31, %v718_v32  ;;  %v2356_v34 = vpop.f32.mrb[9].mxu1  ;;  %v973_v31 = vld [vmem:[%s3578_s16 + $0x68] sm:$0xff]  ;;  %v893_v32 = vpack.c.bf16 %v885_v29, %v883_v28 }
 0x6a8   :  { %v975_v34 = vld [vmem:[%s3578_s16 + $0x78] sm:$0xff] }
 0x6a9   :  { %v725_v35 = vand.u32 2147483647, %v3030_v33  ;;  %v722_v45 = vmax.f32 %v3030_v33, 0.0  ;;  %vm723_vm13 = vcmp.ne.f32.partialorder %v3030_v33, %v3030_v33  ;;  %924 = vmatpush1.bf16.msra.mxu1 %v893_v32 }
 0x6ab   :  { %v726_v36 = vsub.f32 0.0, %v725_v35  ;;  %v972_v35 = vld [vmem:[%s3578_s16 + $0x60] sm:$0xff] }
 0x6ad   :  { %v727_v37 = vmul.f32 1.442695, %v726_v36  ;;  %v974_v36 = vld [vmem:[%s3578_s16 + $0x70] sm:$0xff] }
 0x6af   :  { %2460 = vpow2.f32 %v727_v37  ;;  %v3154_v37 = vpack.c.bf16 %v975_v34, %v973_v31 }
 0x6b9   :  { %v2461_v38 = vpop.eup %2460 }
 0x6ba   :  { %v729_v39 = vadd.f32 1.0, %v2461_v38  ;;  %v732_v40 = vmul.f32 -0.5, %v2461_v38  ;;  %v735_v42 = vand.u32 2147483647, %v2461_v38 }
 0x6bc   :  { %2462 = vlog2.f32 %v729_v39  ;;  %v733_v41 = vadd.f32 1.0, %v732_v40  ;;  %vm736_vm12 = vcmp.lt.f32.partialorder %v735_v42, 0.0004427343  ;;  %v888_v39 = vld [vmem:[%s3576_s14 + $0x68] sm:$0x3]  ;;  %v2697_v42 = vmov 0  }
 0x6bd   :  { %v887_v40 = vld [vmem:[%s3576_s14 + $0x60] sm:$0x3]  ;;  %951 = vmatprep.mubr.bf16.mxu1 %v2697_v42 }
 0x6be   :  { %v734_v44 = vmul.f32 %v2461_v38, %v733_v41  ;;  %v3156_v38 = vpack.c.bf16 %v974_v36, %v972_v35  ;;  %v896_v41 = vpack.c.bf16 %v888_v39, %v888_v39 }
 0x6c0   :  { %2232 = vmatprep.subr.msk.bf16.mxu1 %vm563_vm10, %v896_v41 }
 0x6c6   :  { %v2463_v30 = vpop.eup %2462 }
 0x6c7   :  { %v731_v43 = vmul.f32 0.6931472, %v2463_v30  ;;  %v895_v30 = vpack.c.bf16 %v887_v40, %v887_v40 }
 0x6c9   :  { %v737_v46 = vsel %vm736_vm12, %v734_v44, %v731_v43  ;;  %v914_v43 = vsel %vm563_vm10, %v895_v30, 0  ;;  %v2229_v44 = vld [vmem:[%s3575_s13] ss:$0 sm:$0xff] }
 0x6ca   :  { %v738_v47 = vadd.f32 %v737_v46, %v722_v45  ;;  %926 = vmatpush1.bf16.msra.mxu1 %v914_v43 }
 0x6cb   :  { %1073 = vmatprep.subr.bf16.mxu1 %v3047_v52 }
 0x6cc   :  { %v3037_v48 = vsel %vm723_vm13, %v3030_v33, %v738_v47 }
 0x6cd   :  { %2464 = vrsqrt.f32 %v3037_v48  ;;  %vm772_vm14 = vcmp.eq.f32.partialorder %v3037_v48, inf  ;;  %v775_v1 = vand.u32 2147483648, %v3037_v48  ;;  %vm774_vm15 = vcmp.eq.f32.partialorder %v3037_v48, 0.0 }
 0x6d7   :  { %v2465_v59 = vpop.eup %2464 }
 0x6d8   :  { %v771_v60 = vmul.f32 %v2465_v59, %v3037_v48  ;;  %v984_v59 = vld [vmem:[%s3579_s17] sm:$0x3]  ;;  %s2699_s17 = smov 50  }
 0x6d9   :  { %v3201_v62 = vrot.slane %v984_v59, %v901_v58 }
 0x6da   :  { %v773_v4 = vsel %vm772_vm14, %v3037_v48, %v771_v60  ;;  %v897_v60 = vld [vmem:[%s3577_s15] sm:$0x3]  ;;  %s2698_s15 = smov 64  }
 0x6db   :  { %v776_v6 = vsel %vm774_vm15, %v775_v1, %v773_v4  ;;  %v902_v63 = vrot.slane %v897_v60, %v901_v58 }
 0x6dc   :  { %778 = vrot.lane.b32.xlu0 %v776_v6, %s2696_s8 }
 0x74e   :  { %v779_v12 = vpop.permute.xlu0 %778 }
 0x74f   :  { %v781_v15 = vmul.f32 %v779_v12, %v769_v61  ;;  %v905_v61 = vsub.s32 1, %v900_v57 }
 0x751   :  { %v782_v17 = vadd.f32 %v781_v15, %v3030_v33  ;;  %v3207_v10 = vrot.slane %v984_v59, %v905_v61  ;;  %v906_v11 = vrot.slane %v897_v60, %v905_v61 }
 0x753   :  { %2372 = vmatmul.mubr.msk.f32.vlgmr.msra.gmra.mrb[8].mxu0 %vm645_vm3, %v782_v17 }
 0x754   :  { %1001 = vmatpush1.bf16.msra.mxu0 %v3101_v16  ;;  %1032 = vmatprep.mubr.bf16.mxu0 %v2697_v42 }
 0x755   :  { %1002 = vmatprep.subr.bf16.mxu0 %v3104_v18 }
 0x758   :  { %1003 = vmatpush1.bf16.msra.mxu0 %v3120_v23 }
 0x759   :  { %1004 = vmatprep.subr.bf16.mxu0 %v3123_v24 }
 0x75c   :  { %1005 = vmatpush1.bf16.msra.mxu0 %v3132_v27 }
 0x75d   :  { %1006 = vmatprep.subr.bf16.mxu0 %v3154_v37 }
 0x760   :  { %1007 = vmatpush1.bf16.msra.mxu0 %v3156_v38 }
 0x761   :  { %1145 = vmatprep.subr.bf16.mxu0 %v3047_v52 }
 0x763   :  { %1033 = vmatmul.mubr.bf16.vlgmr.msra.gmra.mrb[12].mxu0 %v2697_v42 }
 0x764   :  { %1146 = vmatpush1.bf16.msra.mxu0 %v3101_v16  ;;  %1177 = vmatprep.mubr.bf16.mxu0 %v2697_v42 }
 0x765   :  { %1147 = vmatprep.subr.bf16.mxu0 %v3104_v18 }
 0x768   :  { %1148 = vmatpush1.bf16.msra.mxu0 %v3120_v23 }
 0x769   :  { %1149 = vmatprep.subr.bf16.mxu0 %v3123_v24 }
 0x76c   :  { %1150 = vmatpush1.bf16.msra.mxu0 %v3132_v27 }
 0x76d   :  { %1151 = vmatprep.subr.bf16.mxu0 %v3154_v37 }
 0x770   :  { %1152 = vmatpush1.bf16.msra.mxu0 %v3156_v38 }
 0x771   :  { %1289 = vmatprep.subr.bf16.mxu0 %v3047_v52 }
 0x826   :  { %v869_v45 = vpop.f32.mrb[8].mxu0 }
 0x827   :  { %v870_v46 = vadd.f32 %v2229_v44, %v869_v45  ;;  %v2373_v47 = vpop.f32.mrb[9].mxu0 }
 0x829   :  { %v873_v49 = vmax.f32 %v870_v46, 0.0 }
 0x82b   :  { %v874_v50 = vpack.c.bf16 %v873_v49, %v873_v49 }
 0x82d   :  { %2233 = vmatmul.mubr.msk.bf16.vlgmr.msra.gmra.mrb[12].mxu1 %vm645_vm3, %v874_v50 }
 0x82e   :  { %1074 = vmatpush1.bf16.msra.mxu1 %v3101_v16  ;;  %1105 = vmatprep.mubr.bf16.mxu1 %v2697_v42 }
 0x82f   :  { %1075 = vmatprep.subr.bf16.mxu1 %v3104_v18 }
 0x832   :  { %1076 = vmatpush1.bf16.msra.mxu1 %v3120_v23 }
 0x833   :  { %1077 = vmatprep.subr.bf16.mxu1 %v3123_v24 }
 0x836   :  { %1078 = vmatpush1.bf16.msra.mxu1 %v3132_v27  ;;  %v1034_v51 = vpop.f32.mrb[12].mxu0 }
 0x837   :  { %1079 = vmatprep.subr.bf16.mxu1 %v3154_v37  ;;  %v1036_v53 = vpop.f32.mrb[13].mxu0  ;;  %v1035_v0 = vadd.f32 %v1034_v51, %v3201_v62 }
 0x838   :  { %v1038_v54 = vpop.f32.mrb[14].mxu0  ;;  %v1037_v12 = vadd.f32 %v1036_v53, %v3207_v10 }
 0x839   :  { %v1039_v55 = vpop.f32.mrb[15].mxu0 }
 0x83a   :  { %1080 = vmatpush1.bf16.msra.mxu1 %v3156_v38 }
 0x83b   :  { %1217 = vmatprep.subr.bf16.mxu1 %v3047_v52 }
 0x900   :  { %v953_v1 = vpop.f32.mrb[12].mxu1 }
 0x901   :  { %v3204_v2 = vadd.f32 %v953_v1, %v902_v63  ;;  %v955_v3 = vpop.f32.mrb[13].mxu1 }
 0x902   :  { %v957_v4 = vpop.f32.mrb[14].mxu1  ;;  %v3210_v14 = vadd.f32 %v955_v3, %v906_v11 }
 0x903   :  { %v958_v5 = vpop.f32.mrb[15].mxu1  ;;  %v1041_v6 = vadd.f32 %v1035_v0, %v3204_v2 }
 0x905   :  { %v2234_v7 = vmul.f32 -1.442695, %v1041_v6 }
 0x907   :  { %2466 = vpow2.f32 %v2234_v7 }
 0x911   :  { %v2467_v8 = vpop.eup %2466 }
 0x912   :  { %v1045_v9 = vadd.f32 1.0, %v2467_v8 }
 0x914   :  { %2468 = vrcp.f32 %v1045_v9 }
 0x91e   :  { %v2469_v13 = vpop.eup %2468 }
 0x91f   :  { %v1048_v15 = vmul.f32 %v2469_v13, %v1037_v12  ;;  %v1051_v20 = vsub.f32 1.0, %v2469_v13  ;;  %v1057_v22 = vmul.f32 0.0, %v2469_v13 }
 0x921   :  { %v1049_v17 = vadd.f32 %v1048_v15, %v3210_v14 }
 0x923   :  { %2470 = vtanh.f32 %v1049_v17 }
 0x92d   :  { %v2471_v19 = vpop.eup %2470 }
 0x92e   :  { %1053 = vrot.lane.b32.xlu1 %v2471_v19, %s2698_s15 }
 0x9a0   :  { %v1054_v21 = vpop.permute.xlu1 %1053 }
 0x9a1   :  { %v1056_v25 = vmul.f32 %v1054_v21, %v1051_v20 }
 0x9a3   :  { %v3214_v26 = vadd.f32 %v1057_v22, %v1056_v25 }
 0x9a5   :  { %v1066_v28 = vpack.c.bf16 %v3214_v26, %v3214_v26 }
 0x9a7   :  { %1068 = vrot.lane.b32.xlu0 %v1066_v28, %s2698_s15 }
 0xa19   :  { %v1069_v29 = vpop.permute.xlu0 %1068 }
 0xa1a   :  { %2235 = vmatmul.mubr.msk.bf16.vlgmr.msra.gmra.mrb[16].mxu1 %vm996_vm1, %v1069_v29 }
 0xa1b   :  { %1218 = vmatpush1.bf16.msra.mxu1 %v3101_v16  ;;  %1249 = vmatprep.mubr.bf16.mxu1 %v2697_v42 }
 0xa1c   :  { %1219 = vmatprep.subr.bf16.mxu1 %v3104_v18 }
 0xa1f   :  { %1220 = vmatpush1.bf16.msra.mxu1 %v3120_v23 }
 0xa20   :  { %1221 = vmatprep.subr.bf16.mxu1 %v3123_v24 }
 0xa23   :  { %1222 = vmatpush1.bf16.msra.mxu1 %v3132_v27 }
 0xa24   :  { %1223 = vmatprep.subr.bf16.mxu1 %v3154_v37 }
 0xa27   :  { %1224 = vmatpush1.bf16.msra.mxu1 %v3156_v38 }
 0xa28   :  { %1361 = vmatprep.subr.bf16.mxu1 %v3047_v52 }
 0xaed   :  { %v1107_v31 = vpop.f32.mrb[16].mxu1 }
 0xaee   :  { %v1108_v32 = vadd.f32 %v1107_v31, %v3201_v62  ;;  %v1109_v34 = vpop.f32.mrb[17].mxu1 }
 0xaef   :  { %v1111_v35 = vpop.f32.mrb[18].mxu1  ;;  %v1110_v43 = vadd.f32 %v1109_v34, %v3207_v10 }
 0xaf0   :  { %v1114_v36 = vadd.f32 %v1108_v32, %v3204_v2  ;;  %v1112_v39 = vpop.f32.mrb[19].mxu1 }
 0xaf2   :  { %v2236_v40 = vmul.f32 -1.442695, %v1114_v36 }
 0xaf4   :  { %2472 = vpow2.f32 %v2236_v40 }
 0xafe   :  { %v2473_v41 = vpop.eup %2472 }
 0xaff   :  { %v1118_v30 = vadd.f32 1.0, %v2473_v41 }
 0xb01   :  { %2474 = vrcp.f32 %v1118_v30 }
 0xb0b   :  { %v2475_v44 = vpop.eup %2474 }
 0xb0c   :  { %v1121_v45 = vmul.f32 %v2475_v44, %v1110_v43  ;;  %v1124_v49 = vsub.f32 1.0, %v2475_v44  ;;  %v1130_v51 = vmul.f32 %v2475_v44, %v3214_v26 }
 0xb0e   :  { %v1122_v46 = vadd.f32 %v1121_v45, %v3210_v14 }
 0xb10   :  { %2476 = vtanh.f32 %v1122_v46 }
 0xb1a   :  { %v2477_v47 = vpop.eup %2476 }
 0xb1b   :  { %1126 = vrot.lane.b32.xlu1 %v2477_v47, %s2698_s15 }
 0xb8d   :  { %v1127_v50 = vpop.permute.xlu1 %1126 }
 0xb8e   :  { %v1129_v53 = vmul.f32 %v1127_v50, %v1124_v49 }
 0xb90   :  { %v3235_v54 = vadd.f32 %v1130_v51, %v1129_v53 }
 0xb92   :  { %v1138_v55 = vpack.c.bf16 %v3235_v54, %v3235_v54 }
 0xb94   :  { %1140 = vrot.lane.b32.xlu0 %v1138_v55, %s2698_s15 }
 0xc06   :  { %v1141_v56 = vpop.permute.xlu0 %1140 }
 0xc07   :  { %2237 = vmatmul.mubr.msk.bf16.vlgmr.msra.gmra.mrb[16].mxu0 %vm996_vm1, %v1141_v56 }
 0xc08   :  { %1290 = vmatpush1.bf16.msra.mxu0 %v3101_v16  ;;  %1321 = vmatprep.mubr.bf16.mxu0 %v2697_v42 }
 0xc09   :  { %1291 = vmatprep.subr.bf16.mxu0 %v3104_v18 }
 0xc0c   :  { %1292 = vmatpush1.bf16.msra.mxu0 %v3120_v23 }
 0xc0d   :  { %1293 = vmatprep.subr.bf16.mxu0 %v3123_v24 }
 0xc10   :  { %1294 = vmatpush1.bf16.msra.mxu0 %v3132_v27 }
 0xc11   :  { %1295 = vmatprep.subr.bf16.mxu0 %v3154_v37 }
 0xc14   :  { %1296 = vmatpush1.bf16.msra.mxu0 %v3156_v38 }
 0xc15   :  { %1433 = vmatprep.subr.bf16.mxu0 %v3047_v52 }
 0xcda   :  { %v1179_v57 = vpop.f32.mrb[16].mxu0 }
 0xcdb   :  { %v1180_v58 = vadd.f32 %v1179_v57, %v3201_v62  ;;  %v1181_v59 = vpop.f32.mrb[17].mxu0 }
 0xcdc   :  { %v1183_v60 = vpop.f32.mrb[18].mxu0  ;;  %v1182_v5 = vadd.f32 %v1181_v59, %v3207_v10 }
 0xcdd   :  { %v1186_v63 = vadd.f32 %v1180_v58, %v3204_v2  ;;  %v1184_v0 = vpop.f32.mrb[19].mxu0 }
 0xcdf   :  { %v2238_v1 = vmul.f32 -1.442695, %v1186_v63 }
 0xce1   :  { %2478 = vpow2.f32 %v2238_v1 }
 0xceb   :  { %v2479_v3 = vpop.eup %2478 }
 0xcec   :  { %v1190_v4 = vadd.f32 1.0, %v2479_v3 }
 0xcee   :  { %2480 = vrcp.f32 %v1190_v4 }
 0xcf8   :  { %v2481_v6 = vpop.eup %2480 }
 0xcf9   :  { %v1193_v7 = vmul.f32 %v2481_v6, %v1182_v5  ;;  %v1196_v61 = vsub.f32 1.0, %v2481_v6  ;;  %v1202_v12 = vmul.f32 %v2481_v6, %v3235_v54 }
 0xcfb   :  { %v1194_v8 = vadd.f32 %v1193_v7, %v3210_v14 }
 0xcfd   :  { %2482 = vtanh.f32 %v1194_v8 }
 0xd07   :  { %v2483_v9 = vpop.eup %2482 }
 0xd08   :  { %1198 = vrot.lane.b32.xlu1 %v2483_v9, %s2698_s15 }
 0xd7a   :  { %v1199_v11 = vpop.permute.xlu1 %1198 }
 0xd7b   :  { %v1201_v13 = vmul.f32 %v1199_v11, %v1196_v61 }
 0xd7d   :  { %v3256_v15 = vadd.f32 %v1202_v12, %v1201_v13 }
 0xd7f   :  { %v1210_v17 = vpack.c.bf16 %v3256_v15, %v3256_v15 }
 0xd81   :  { %1212 = vrot.lane.b32.xlu0 %v1210_v17, %s2698_s15 }
 0xdf3   :  { %v1213_v19 = vpop.permute.xlu0 %1212 }
 0xdf4   :  { %2239 = vmatmul.mubr.msk.bf16.vlgmr.msra.gmra.mrb[20].mxu1 %vm996_vm1, %v1213_v19 }
 0xdf5   :  { %1362 = vmatpush1.bf16.msra.mxu1 %v3101_v16  ;;  %1393 = vmatprep.mubr.bf16.mxu1 %v2697_v42 }
 0xdf6   :  { %1363 = vmatprep.subr.bf16.mxu1 %v3104_v18 }
 0xdf9   :  { %1364 = vmatpush1.bf16.msra.mxu1 %v3120_v23 }
 0xdfa   :  { %1365 = vmatprep.subr.bf16.mxu1 %v3123_v24 }
 0xdfd   :  { %1366 = vmatpush1.bf16.msra.mxu1 %v3132_v27 }
 0xdfe   :  { %1367 = vmatprep.subr.bf16.mxu1 %v3154_v37 }
 0xe01   :  { %1368 = vmatpush1.bf16.msra.mxu1 %v3156_v38 }
 0xe02   :  { %1505 = vmatprep.subr.bf16.mxu1 %v3047_v52 }
 0xec7   :  { %v1251_v20 = vpop.f32.mrb[20].mxu1 }
 0xec8   :  { %v1252_v21 = vadd.f32 %v1251_v20, %v3201_v62  ;;  %v1253_v22 = vpop.f32.mrb[21].mxu1 }
 0xec9   :  { %v1255_v25 = vpop.f32.mrb[22].mxu1  ;;  %v1254_v35 = vadd.f32 %v1253_v22, %v3207_v10 }
 0xeca   :  { %v1258_v28 = vadd.f32 %v1252_v21, %v3204_v2  ;;  %v1256_v29 = vpop.f32.mrb[23].mxu1 }
 0xecc   :  { %v2240_v31 = vmul.f32 -1.442695, %v1258_v28 }
 0xece   :  { %2484 = vpow2.f32 %v2240_v31 }
 0xed8   :  { %v2485_v32 = vpop.eup %2484 }
 0xed9   :  { %v1262_v34 = vadd.f32 1.0, %v2485_v32 }
 0xedb   :  { %2486 = vrcp.f32 %v1262_v34 }
 0xee5   :  { %v2487_v36 = vpop.eup %2486 }
 0xee6   :  { %v1265_v39 = vmul.f32 %v2487_v36, %v1254_v35  ;;  %v1268_v30 = vsub.f32 1.0, %v2487_v36  ;;  %v1274_v44 = vmul.f32 %v2487_v36, %v3256_v15 }
 0xee8   :  { %v1266_v40 = vadd.f32 %v1265_v39, %v3210_v14 }
 0xeea   :  { %2488 = vtanh.f32 %v1266_v40 }
 0xef4   :  { %v2489_v41 = vpop.eup %2488 }
 0xef5   :  { %1270 = vrot.lane.b32.xlu1 %v2489_v41, %s2698_s15 }
 0xf67   :  { %v1271_v43 = vpop.permute.xlu1 %1270 }
 0xf68   :  { %v1273_v45 = vmul.f32 %v1271_v43, %v1268_v30 }
 0xf6a   :  { %v3277_v46 = vadd.f32 %v1274_v44, %v1273_v45 }
 0xf6c   :  { %v1282_v47 = vpack.c.bf16 %v3277_v46, %v3277_v46 }
 0xf6e   :  { %1284 = vrot.lane.b32.xlu0 %v1282_v47, %s2698_s15 }
 0xfe0   :  { %v1285_v49 = vpop.permute.xlu0 %1284 }
 0xfe1   :  { %2241 = vmatmul.mubr.msk.bf16.vlgmr.msra.gmra.mrb[20].mxu0 %vm996_vm1, %v1285_v49 }
 0xfe2   :  { %1434 = vmatpush1.bf16.msra.mxu0 %v3101_v16  ;;  %1465 = vmatprep.mubr.bf16.mxu0 %v2697_v42 }
 0xfe3   :  { %1435 = vmatprep.subr.bf16.mxu0 %v3104_v18 }
 0xfe6   :  { %1436 = vmatpush1.bf16.msra.mxu0 %v3120_v23 }
 0xfe7   :  { %1437 = vmatprep.subr.bf16.mxu0 %v3123_v24 }
 0xfea   :  { %1438 = vmatpush1.bf16.msra.mxu0 %v3132_v27 }
 0xfeb   :  { %1439 = vmatprep.subr.bf16.mxu0 %v3154_v37 }
 0xfee   :  { %1440 = vmatpush1.bf16.msra.mxu0 %v3156_v38 }
 0xfef   :  { %1577 = vmatprep.subr.bf16.mxu0 %v3047_v52 }
0x10b4   :  { %v1323_v50 = vpop.f32.mrb[20].mxu0 }
0x10b5   :  { %v1324_v51 = vadd.f32 %v1323_v50, %v3201_v62  ;;  %v1325_v53 = vpop.f32.mrb[21].mxu0 }
0x10b6   :  { %v1327_v55 = vpop.f32.mrb[22].mxu0  ;;  %v1326_v63 = vadd.f32 %v1325_v53, %v3207_v10 }
0x10b7   :  { %v1330_v56 = vadd.f32 %v1324_v51, %v3204_v2  ;;  %v1328_v57 = vpop.f32.mrb[23].mxu0 }
0x10b9   :  { %v2242_v58 = vmul.f32 -1.442695, %v1330_v56 }
0x10bb   :  { %2490 = vpow2.f32 %v2242_v58 }
0x10c5   :  { %v2491_v59 = vpop.eup %2490 }
0x10c6   :  { %v1334_v60 = vadd.f32 1.0, %v2491_v59 }
0x10c8   :  { %2492 = vrcp.f32 %v1334_v60 }
0x10d2   :  { %v2493_v0 = vpop.eup %2492 }
0x10d3   :  { %v1337_v1 = vmul.f32 %v2493_v0, %v1326_v63  ;;  %v1340_v5 = vsub.f32 1.0, %v2493_v0  ;;  %v1346_v7 = vmul.f32 %v2493_v0, %v3277_v46 }
0x10d5   :  { %v1338_v3 = vadd.f32 %v1337_v1, %v3210_v14 }
0x10d7   :  { %2494 = vtanh.f32 %v1338_v3 }
0x10e1   :  { %v2495_v4 = vpop.eup %2494 }
0x10e2   :  { %1342 = vrot.lane.b32.xlu1 %v2495_v4, %s2698_s15 }
0x1154   :  { %v1343_v6 = vpop.permute.xlu1 %1342 }
0x1155   :  { %v1345_v8 = vmul.f32 %v1343_v6, %v1340_v5 }
0x1157   :  { %v3298_v9 = vadd.f32 %v1346_v7, %v1345_v8 }
0x1159   :  { %v1354_v61 = vpack.c.bf16 %v3298_v9, %v3298_v9 }
0x115b   :  { %1356 = vrot.lane.b32.xlu0 %v1354_v61, %s2698_s15 }
0x11cd   :  { %v1357_v11 = vpop.permute.xlu0 %1356 }
0x11ce   :  { %2243 = vmatmul.mubr.msk.bf16.vlgmr.msra.gmra.mrb[24].mxu1 %vm996_vm1, %v1357_v11 }
0x11cf   :  { %1506 = vmatpush1.bf16.msra.mxu1 %v3101_v16  ;;  %1537 = vmatprep.mubr.bf16.mxu1 %v2697_v42 }
0x11d0   :  { %1507 = vmatprep.subr.bf16.mxu1 %v3104_v18 }
0x11d3   :  { %1508 = vmatpush1.bf16.msra.mxu1 %v3120_v23 }
0x11d4   :  { %1509 = vmatprep.subr.bf16.mxu1 %v3123_v24 }
0x11d7   :  { %1510 = vmatpush1.bf16.msra.mxu1 %v3132_v27 }
0x11d8   :  { %1511 = vmatprep.subr.bf16.mxu1 %v3154_v37 }
0x11db   :  { %1512 = vmatpush1.bf16.msra.mxu1 %v3156_v38 }
0x11dc   :  { %1649 = vmatprep.subr.bf16.mxu1 %v3047_v52 }
0x12a1   :  { %v1395_v12 = vpop.f32.mrb[24].mxu1 }
0x12a2   :  { %v1396_v13 = vadd.f32 %v1395_v12, %v3201_v62  ;;  %v1397_v17 = vpop.f32.mrb[25].mxu1 }
0x12a3   :  { %v1399_v19 = vpop.f32.mrb[26].mxu1  ;;  %v1398_v29 = vadd.f32 %v1397_v17, %v3207_v10 }
0x12a4   :  { %v1402_v20 = vadd.f32 %v1396_v13, %v3204_v2  ;;  %v1400_v21 = vpop.f32.mrb[27].mxu1 }
0x12a6   :  { %v2244_v22 = vmul.f32 -1.442695, %v1402_v20 }
0x12a8   :  { %2496 = vpow2.f32 %v2244_v22 }
0x12b2   :  { %v2497_v25 = vpop.eup %2496 }
0x12b3   :  { %v1406_v28 = vadd.f32 1.0, %v2497_v25 }
0x12b5   :  { %2498 = vrcp.f32 %v1406_v28 }
0x12bf   :  { %v2499_v31 = vpop.eup %2498 }
0x12c0   :  { %v1409_v32 = vmul.f32 %v2499_v31, %v1398_v29  ;;  %v1412_v36 = vsub.f32 1.0, %v2499_v31  ;;  %v1418_v40 = vmul.f32 %v2499_v31, %v3298_v9 }
0x12c2   :  { %v1410_v34 = vadd.f32 %v1409_v32, %v3210_v14 }
0x12c4   :  { %2500 = vtanh.f32 %v1410_v34 }
0x12ce   :  { %v2501_v35 = vpop.eup %2500 }
0x12cf   :  { %1414 = vrot.lane.b32.xlu1 %v2501_v35, %s2698_s15 }
0x1341   :  { %v1415_v39 = vpop.permute.xlu1 %1414 }
0x1342   :  { %v1417_v41 = vmul.f32 %v1415_v39, %v1412_v36 }
0x1344   :  { %v3319_v30 = vadd.f32 %v1418_v40, %v1417_v41 }
0x1346   :  { %v1426_v43 = vpack.c.bf16 %v3319_v30, %v3319_v30 }
0x1348   :  { %1428 = vrot.lane.b32.xlu0 %v1426_v43, %s2698_s15 }
0x13ba   :  { %v1429_v44 = vpop.permute.xlu0 %1428 }
0x13bb   :  { %2245 = vmatmul.mubr.msk.bf16.vlgmr.msra.gmra.mrb[24].mxu0 %vm996_vm1, %v1429_v44 }
0x13bc   :  { %1578 = vmatpush1.bf16.msra.mxu0 %v3101_v16  ;;  %1609 = vmatprep.mubr.bf16.mxu0 %v2697_v42 }
0x13bd   :  { %1579 = vmatprep.subr.bf16.mxu0 %v3104_v18 }
0x13c0   :  { %1580 = vmatpush1.bf16.msra.mxu0 %v3120_v23 }
0x13c1   :  { %1581 = vmatprep.subr.bf16.mxu0 %v3123_v24 }
0x13c4   :  { %1582 = vmatpush1.bf16.msra.mxu0 %v3132_v27 }
0x13c5   :  { %1583 = vmatprep.subr.bf16.mxu0 %v3154_v37 }
0x13c8   :  { %1584 = vmatpush1.bf16.msra.mxu0 %v3156_v38 }
0x13c9   :  { %1721 = vmatprep.subr.bf16.mxu0 %v3047_v52 }
0x148e   :  { %v1467_v45 = vpop.f32.mrb[24].mxu0 }
0x148f   :  { %v1468_v47 = vadd.f32 %v1467_v45, %v3201_v62  ;;  %v1469_v49 = vpop.f32.mrb[25].mxu0 }
0x1490   :  { %v1471_v50 = vpop.f32.mrb[26].mxu0  ;;  %v1470_v58 = vadd.f32 %v1469_v49, %v3207_v10 }
0x1491   :  { %v1474_v51 = vadd.f32 %v1468_v47, %v3204_v2  ;;  %v1472_v53 = vpop.f32.mrb[27].mxu0 }
0x1493   :  { %v2246_v55 = vmul.f32 -1.442695, %v1474_v51 }
0x1495   :  { %2502 = vpow2.f32 %v2246_v55 }
0x149f   :  { %v2503_v56 = vpop.eup %2502 }
0x14a0   :  { %v1478_v57 = vadd.f32 1.0, %v2503_v56 }
0x14a2   :  { %2504 = vrcp.f32 %v1478_v57 }
0x14ac   :  { %v2505_v59 = vpop.eup %2504 }
0x14ad   :  { %v1481_v60 = vmul.f32 %v2505_v59, %v1470_v58  ;;  %v1484_v1 = vsub.f32 1.0, %v2505_v59  ;;  %v1490_v4 = vmul.f32 %v2505_v59, %v3319_v30 }
0x14af   :  { %v1482_v63 = vadd.f32 %v1481_v60, %v3210_v14 }
0x14b1   :  { %2506 = vtanh.f32 %v1482_v63 }
0x14bb   :  { %v2507_v0 = vpop.eup %2506 }
0x14bc   :  { %1486 = vrot.lane.b32.xlu1 %v2507_v0, %s2698_s15 }
0x152e   :  { %v1487_v3 = vpop.permute.xlu1 %1486 }
0x152f   :  { %v1489_v5 = vmul.f32 %v1487_v3, %v1484_v1 }
0x1531   :  { %v3340_v6 = vadd.f32 %v1490_v4, %v1489_v5 }
0x1533   :  { %v1498_v7 = vpack.c.bf16 %v3340_v6, %v3340_v6 }
0x1535   :  { %1500 = vrot.lane.b32.xlu0 %v1498_v7, %s2698_s15 }
0x15a7   :  { %v1501_v8 = vpop.permute.xlu0 %1500 }
0x15a8   :  { %2247 = vmatmul.mubr.msk.bf16.vlgmr.msra.gmra.mrb[28].mxu1 %vm996_vm1, %v1501_v8 }
0x15a9   :  { %1650 = vmatpush1.bf16.msra.mxu1 %v3101_v16  ;;  %1681 = vmatprep.mubr.bf16.mxu1 %v2697_v42 }
0x15aa   :  { %1651 = vmatprep.subr.bf16.mxu1 %v3104_v18 }
0x15ad   :  { %1652 = vmatpush1.bf16.msra.mxu1 %v3120_v23 }
0x15ae   :  { %1653 = vmatprep.subr.bf16.mxu1 %v3123_v24 }
0x15b1   :  { %1654 = vmatpush1.bf16.msra.mxu1 %v3132_v27 }
0x15b2   :  { %1655 = vmatprep.subr.bf16.mxu1 %v3154_v37 }
0x15b5   :  { %1656 = vmatpush1.bf16.msra.mxu1 %v3156_v38 }
0x15b6   :  { %1793 = vmatprep.subr.bf16.mxu1 %v3047_v52 }
0x167b   :  { %v1539_v61 = vpop.f32.mrb[28].mxu1 }
0x167c   :  { %v1540_v11 = vadd.f32 %v1539_v61, %v3201_v62  ;;  %v1541_v12 = vpop.f32.mrb[29].mxu1 }
0x167d   :  { %v1543_v13 = vpop.f32.mrb[30].mxu1  ;;  %v1542_v25 = vadd.f32 %v1541_v12, %v3207_v10 }
0x167e   :  { %v1546_v17 = vadd.f32 %v1540_v11, %v3204_v2  ;;  %v1544_v19 = vpop.f32.mrb[31].mxu1 }
0x1680   :  { %v2248_v20 = vmul.f32 -1.442695, %v1546_v17 }
0x1682   :  { %2508 = vpow2.f32 %v2248_v20 }
0x168c   :  { %v2509_v21 = vpop.eup %2508 }
0x168d   :  { %v1550_v22 = vadd.f32 1.0, %v2509_v21 }
0x168f   :  { %2510 = vrcp.f32 %v1550_v22 }
0x1699   :  { %v2511_v28 = vpop.eup %2510 }
0x169a   :  { %v1553_v29 = vmul.f32 %v2511_v28, %v1542_v25  ;;  %v1556_v34 = vsub.f32 1.0, %v2511_v28  ;;  %v1562_v36 = vmul.f32 %v2511_v28, %v3340_v6 }
0x169c   :  { %v1554_v31 = vadd.f32 %v1553_v29, %v3210_v14 }
0x169e   :  { %2512 = vtanh.f32 %v1554_v31 }
0x16a8   :  { %v2513_v32 = vpop.eup %2512 }
0x16a9   :  { %1558 = vrot.lane.b32.xlu1 %v2513_v32, %s2698_s15 }
0x171b   :  { %v1559_v35 = vpop.permute.xlu1 %1558 }
0x171c   :  { %v1561_v39 = vmul.f32 %v1559_v35, %v1556_v34 }
0x171e   :  { %v3361_v40 = vadd.f32 %v1562_v36, %v1561_v39 }
0x1720   :  { %v1570_v41 = vpack.c.bf16 %v3361_v40, %v3361_v40 }
0x1722   :  { %1572 = vrot.lane.b32.xlu0 %v1570_v41, %s2698_s15 }
0x1794   :  { %v1573_v43 = vpop.permute.xlu0 %1572 }
0x1795   :  { %2249 = vmatmul.mubr.msk.bf16.vlgmr.msra.gmra.mrb[28].mxu0 %vm996_vm1, %v1573_v43 }
0x1796   :  { %1722 = vmatpush1.bf16.msra.mxu0 %v3101_v16  ;;  %1753 = vmatprep.mubr.bf16.mxu0 %v2697_v42 }
0x1797   :  { %1723 = vmatprep.subr.bf16.mxu0 %v3104_v18 }
0x179a   :  { %1724 = vmatpush1.bf16.msra.mxu0 %v3120_v23 }
0x179b   :  { %1725 = vmatprep.subr.bf16.mxu0 %v3123_v24 }
0x179e   :  { %1726 = vmatpush1.bf16.msra.mxu0 %v3132_v27 }
0x179f   :  { %1727 = vmatprep.subr.bf16.mxu0 %v3154_v37 }
0x17a2   :  { %1728 = vmatpush1.bf16.msra.mxu0 %v3156_v38 }
0x17a3   :  { %1865 = vmatprep.subr.bf16.mxu0 %v3047_v52 }
0x1868   :  { %v1611_v44 = vpop.f32.mrb[28].mxu0 }
0x1869   :  { %v1612_v45 = vadd.f32 %v1611_v44, %v3201_v62  ;;  %v1613_v47 = vpop.f32.mrb[29].mxu0 }
0x186a   :  { %v1615_v49 = vpop.f32.mrb[30].mxu0  ;;  %v1614_v57 = vadd.f32 %v1613_v47, %v3207_v10 }
0x186b   :  { %v1618_v50 = vadd.f32 %v1612_v45, %v3204_v2  ;;  %v1616_v51 = vpop.f32.mrb[31].mxu0 }
0x186d   :  { %v2250_v53 = vmul.f32 -1.442695, %v1618_v50 }
0x186f   :  { %2514 = vpow2.f32 %v2250_v53 }
0x1879   :  { %v2515_v55 = vpop.eup %2514 }
0x187a   :  { %v1622_v56 = vadd.f32 1.0, %v2515_v55 }
0x187c   :  { %2516 = vrcp.f32 %v1622_v56 }
0x1886   :  { %v2517_v58 = vpop.eup %2516 }
0x1887   :  { %v1625_v59 = vmul.f32 %v2517_v58, %v1614_v57  ;;  %v1628_v0 = vsub.f32 1.0, %v2517_v58  ;;  %v1634_v3 = vmul.f32 %v2517_v58, %v3361_v40 }
0x1889   :  { %v1626_v60 = vadd.f32 %v1625_v59, %v3210_v14 }
0x188b   :  { %2518 = vtanh.f32 %v1626_v60 }
0x1895   :  { %v2519_v63 = vpop.eup %2518 }
0x1896   :  { %1630 = vrot.lane.b32.xlu1 %v2519_v63, %s2698_s15 }
0x1908   :  { %v1631_v1 = vpop.permute.xlu1 %1630 }
0x1909   :  { %v1633_v4 = vmul.f32 %v1631_v1, %v1628_v0 }
0x190b   :  { %v3382_v5 = vadd.f32 %v1634_v3, %v1633_v4 }
0x190d   :  { %v1642_v7 = vpack.c.bf16 %v3382_v5, %v3382_v5 }
0x190f   :  { %1644 = vrot.lane.b32.xlu0 %v1642_v7, %s2698_s15 }
0x1981   :  { %v1645_v8 = vpop.permute.xlu0 %1644 }
0x1982   :  { %2251 = vmatmul.mubr.msk.bf16.vlgmr.msra.gmra.mrb[32].mxu1 %vm996_vm1, %v1645_v8 }
0x1983   :  { %1794 = vmatpush1.bf16.msra.mxu1 %v3101_v16  ;;  %1825 = vmatprep.mubr.bf16.mxu1 %v2697_v42 }
0x1984   :  { %1795 = vmatprep.subr.bf16.mxu1 %v3104_v18 }
0x1987   :  { %1796 = vmatpush1.bf16.msra.mxu1 %v3120_v23 }
0x1988   :  { %1797 = vmatprep.subr.bf16.mxu1 %v3123_v24 }
0x198b   :  { %1798 = vmatpush1.bf16.msra.mxu1 %v3132_v27 }
0x198c   :  { %1799 = vmatprep.subr.bf16.mxu1 %v3154_v37 }
0x198f   :  { %1800 = vmatpush1.bf16.msra.mxu1 %v3156_v38 }
0x1990   :  { %1937 = vmatprep.subr.bf16.mxu1 %v3047_v52 }
0x1a55   :  { %v1683_v61 = vpop.f32.mrb[32].mxu1 }
0x1a56   :  { %v1684_v11 = vadd.f32 %v1683_v61, %v3201_v62  ;;  %v1685_v12 = vpop.f32.mrb[33].mxu1 }
0x1a57   :  { %v1687_v13 = vpop.f32.mrb[34].mxu1  ;;  %v1686_v25 = vadd.f32 %v1685_v12, %v3207_v10 }
0x1a58   :  { %v1690_v17 = vadd.f32 %v1684_v11, %v3204_v2  ;;  %v1688_v19 = vpop.f32.mrb[35].mxu1 }
0x1a5a   :  { %v2252_v20 = vmul.f32 -1.442695, %v1690_v17 }
0x1a5c   :  { %2520 = vpow2.f32 %v2252_v20 }
0x1a66   :  { %v2521_v21 = vpop.eup %2520 }
0x1a67   :  { %v1694_v22 = vadd.f32 1.0, %v2521_v21 }
0x1a69   :  { %2522 = vrcp.f32 %v1694_v22 }
0x1a73   :  { %v2523_v28 = vpop.eup %2522 }
0x1a74   :  { %v1697_v29 = vmul.f32 %v2523_v28, %v1686_v25  ;;  %v1700_v34 = vsub.f32 1.0, %v2523_v28  ;;  %v1706_v36 = vmul.f32 %v2523_v28, %v3382_v5 }
0x1a76   :  { %v1698_v31 = vadd.f32 %v1697_v29, %v3210_v14 }
0x1a78   :  { %2524 = vtanh.f32 %v1698_v31 }
0x1a82   :  { %v2525_v32 = vpop.eup %2524 }
0x1a83   :  { %1702 = vrot.lane.b32.xlu1 %v2525_v32, %s2698_s15 }
0x1af5   :  { %v1703_v35 = vpop.permute.xlu1 %1702 }
0x1af6   :  { %v1705_v39 = vmul.f32 %v1703_v35, %v1700_v34 }
0x1af8   :  { %v3403_v41 = vadd.f32 %v1706_v36, %v1705_v39 }
0x1afa   :  { %v1714_v43 = vpack.c.bf16 %v3403_v41, %v3403_v41 }
0x1afc   :  { %1716 = vrot.lane.b32.xlu0 %v1714_v43, %s2698_s15 }
0x1b6e   :  { %v1717_v44 = vpop.permute.xlu0 %1716 }
0x1b6f   :  { %2253 = vmatmul.mubr.msk.bf16.vlgmr.msra.gmra.mrb[32].mxu0 %vm996_vm1, %v1717_v44 }
0x1b70   :  { %1866 = vmatpush1.bf16.msra.mxu0 %v3101_v16  ;;  %1897 = vmatprep.mubr.bf16.mxu0 %v2697_v42 }
0x1b71   :  { %1867 = vmatprep.subr.bf16.mxu0 %v3104_v18 }
0x1b74   :  { %1868 = vmatpush1.bf16.msra.mxu0 %v3120_v23 }
0x1b75   :  { %1869 = vmatprep.subr.bf16.mxu0 %v3123_v24 }
0x1b78   :  { %1870 = vmatpush1.bf16.msra.mxu0 %v3132_v27 }
0x1b79   :  { %1871 = vmatprep.subr.bf16.mxu0 %v3154_v37 }
0x1b7c   :  { %1872 = vmatpush1.bf16.msra.mxu0 %v3156_v38 }
0x1b7d   :  { %2009 = vmatprep.subr.bf16.mxu0 %v3047_v52 }
0x1c42   :  { %v1755_v45 = vpop.f32.mrb[32].mxu0 }
0x1c43   :  { %v1756_v47 = vadd.f32 %v1755_v45, %v3201_v62  ;;  %v1757_v49 = vpop.f32.mrb[33].mxu0 }
0x1c44   :  { %v1759_v50 = vpop.f32.mrb[34].mxu0  ;;  %v1758_v58 = vadd.f32 %v1757_v49, %v3207_v10 }
0x1c45   :  { %v1762_v51 = vadd.f32 %v1756_v47, %v3204_v2  ;;  %v1760_v53 = vpop.f32.mrb[35].mxu0 }
0x1c47   :  { %v2254_v55 = vmul.f32 -1.442695, %v1762_v51 }
0x1c49   :  { %2526 = vpow2.f32 %v2254_v55 }
0x1c53   :  { %v2527_v56 = vpop.eup %2526 }
0x1c54   :  { %v1766_v57 = vadd.f32 1.0, %v2527_v56 }
0x1c56   :  { %2528 = vrcp.f32 %v1766_v57 }
0x1c60   :  { %v2529_v59 = vpop.eup %2528 }
0x1c61   :  { %v1769_v60 = vmul.f32 %v2529_v59, %v1758_v58  ;;  %v1772_v0 = vsub.f32 1.0, %v2529_v59  ;;  %v1778_v3 = vmul.f32 %v2529_v59, %v3403_v41 }
0x1c63   :  { %v1770_v63 = vadd.f32 %v1769_v60, %v3210_v14 }
0x1c65   :  { %2530 = vtanh.f32 %v1770_v63 }
0x1c6f   :  { %v2531_v52 = vpop.eup %2530 }
0x1c70   :  { %1774 = vrot.lane.b32.xlu1 %v2531_v52, %s2698_s15 }
0x1ce2   :  { %v1775_v1 = vpop.permute.xlu1 %1774 }
0x1ce3   :  { %v1777_v4 = vmul.f32 %v1775_v1, %v1772_v0 }
0x1ce5   :  { %v3424_v7 = vadd.f32 %v1778_v3, %v1777_v4 }
0x1ce7   :  { %v1786_v8 = vpack.c.bf16 %v3424_v7, %v3424_v7 }
0x1ce9   :  { %1788 = vrot.lane.b32.xlu0 %v1786_v8, %s2698_s15 }
0x1d5b   :  { %v1789_v61 = vpop.permute.xlu0 %1788 }
0x1d5c   :  { %2255 = vmatmul.mubr.msk.bf16.vlgmr.msra.gmra.mrb[36].mxu1 %vm996_vm1, %v1789_v61 }
0x1d5d   :  { %1938 = vmatpush1.bf16.msra.mxu1 %v3101_v16  ;;  %1969 = vmatprep.mubr.bf16.mxu1 %v2697_v42 }
0x1d5e   :  { %1939 = vmatprep.subr.bf16.mxu1 %v3104_v18 }
0x1d61   :  { %1940 = vmatpush1.bf16.msra.mxu1 %v3120_v23 }
0x1d62   :  { %1941 = vmatprep.subr.bf16.mxu1 %v3123_v24 }
0x1d65   :  { %1942 = vmatpush1.bf16.msra.mxu1 %v3132_v27 }
0x1d66   :  { %1943 = vmatprep.subr.bf16.mxu1 %v3154_v37 }
0x1d69   :  { %1944 = vmatpush1.bf16.msra.mxu1 %v3156_v38 }
0x1e2f   :  { %v1827_v11 = vpop.f32.mrb[36].mxu1 }
0x1e30   :  { %v1828_v12 = vadd.f32 %v1827_v11, %v3201_v62  ;;  %v1829_v13 = vpop.f32.mrb[37].mxu1 }
0x1e31   :  { %v1831_v17 = vpop.f32.mrb[38].mxu1  ;;  %v1830_v28 = vadd.f32 %v1829_v13, %v3207_v10 }
0x1e32   :  { %v1834_v19 = vadd.f32 %v1828_v12, %v3204_v2  ;;  %v1832_v20 = vpop.f32.mrb[39].mxu1 }
0x1e34   :  { %v2256_v21 = vmul.f32 -1.442695, %v1834_v19 }
0x1e36   :  { %2532 = vpow2.f32 %v2256_v21 }
0x1e40   :  { %v2533_v22 = vpop.eup %2532 }
0x1e41   :  { %v1838_v25 = vadd.f32 1.0, %v2533_v22 }
0x1e43   :  { %2534 = vrcp.f32 %v1838_v25 }
0x1e4d   :  { %v2535_v29 = vpop.eup %2534 }
0x1e4e   :  { %v1841_v31 = vmul.f32 %v2535_v29, %v1830_v28  ;;  %v1844_v35 = vsub.f32 1.0, %v2535_v29  ;;  %v1850_v39 = vmul.f32 %v2535_v29, %v3424_v7 }
0x1e50   :  { %v1842_v32 = vadd.f32 %v1841_v31, %v3210_v14 }
0x1e52   :  { %2536 = vtanh.f32 %v1842_v32 }
0x1e5c   :  { %v2537_v34 = vpop.eup %2536 }
0x1e5d   :  { %1846 = vrot.lane.b32.xlu1 %v2537_v34, %s2698_s15 }
0x1ecf   :  { %v1847_v36 = vpop.permute.xlu1 %1846 }
0x1ed0   :  { %v1849_v43 = vmul.f32 %v1847_v36, %v1844_v35  ;;  %v1059_v36 = vmax.f32 %v3214_v26, 0.0  ;;  %v1780_v26 = vmax.f32 %v3424_v7, 0.0 }
0x1ed2   :  { %v3444_v44 = vadd.f32 %v1850_v39, %v1849_v43  ;;  %v1204_v39 = vmax.f32 %v3256_v15, 0.0  ;;  %v1348_v43 = vmax.f32 %v3298_v9, 0.0 }
0x1ed4   :  { %v1858_v45 = vpack.c.bf16 %v3444_v44, %v3444_v44 }
0x1ed6   :  { %1860 = vrot.lane.b32.xlu0 %v1858_v45, %s2698_s15  ;;  %v1492_v45 = vmax.f32 %v3340_v6, 0.0 }
0x1f48   :  { %v1861_v47 = vpop.permute.xlu0 %1860 }
0x1f49   :  { %2257 = vmatmul.mubr.msk.bf16.vlgmr.msra.gmra.mrb[36].mxu0 %vm996_vm1, %v1861_v47  ;;  %v1636_v47 = vmax.f32 %v3382_v5, 0.0 }
0x1f4a   :  { %2010 = vmatpush1.bf16.msra.mxu0 %v3101_v16  ;;  %2041 = vmatprep.mubr.bf16.mxu0 %v2697_v42 }
0x1f4b   :  { %2011 = vmatprep.subr.bf16.mxu0 %v3104_v18 }
0x1f4e   :  { %2012 = vmatpush1.bf16.msra.mxu0 %v3120_v23 }
0x1f4f   :  { %2013 = vmatprep.subr.bf16.mxu0 %v3123_v24 }
0x1f52   :  { %2014 = vmatpush1.bf16.msra.mxu0 %v3132_v27 }
0x1f53   :  { %2015 = vmatprep.subr.bf16.mxu0 %v3154_v37 }
0x1f56   :  { %2016 = vmatpush1.bf16.msra.mxu0 %v3156_v38 }
0x201c   :  { %v1899_v49 = vpop.f32.mrb[36].mxu0 }
0x201d   :  { %v1900_v50 = vadd.f32 %v1899_v49, %v3201_v62  ;;  %v1901_v51 = vpop.f32.mrb[37].mxu0 }
0x201e   :  { %v1903_v53 = vpop.f32.mrb[38].mxu0  ;;  %v1902_v24 = vadd.f32 %v1901_v51, %v3207_v10 }
0x201f   :  { %v1906_v16 = vadd.f32 %v1900_v50, %v3204_v2  ;;  %v1904_v42 = vpop.f32.mrb[39].mxu0 }
0x2021   :  { %v2258_v55 = vmul.f32 -1.442695, %v1906_v16 }
0x2023   :  { %2538 = vpow2.f32 %v2258_v55 }
0x202d   :  { %v2539_v18 = vpop.eup %2538 }
0x202e   :  { %v1910_v23 = vadd.f32 1.0, %v2539_v18 }
0x2030   :  { %2540 = vrcp.f32 %v1910_v23 }
0x203a   :  { %v2541_v27 = vpop.eup %2540 }
0x203b   :  { %v1913_v56 = vmul.f32 %v2541_v27, %v1902_v24  ;;  %v1916_v57 = vsub.f32 1.0, %v2541_v27  ;;  %v1922_v59 = vmul.f32 %v2541_v27, %v3444_v44 }
0x203d   :  { %v1914_v37 = vadd.f32 %v1913_v56, %v3210_v14 }
0x203f   :  { %2542 = vtanh.f32 %v1914_v37 }
0x2049   :  { %v2543_v38 = vpop.eup %2542 }
0x204a   :  { %1918 = vrot.lane.b32.xlu1 %v2543_v38, %s2698_s15 }
0x20bc   :  { %v1919_v58 = vpop.permute.xlu1 %1918 }
0x20bd   :  { %v1921_v60 = vmul.f32 %v1919_v58, %v1916_v57 }
0x20bf   :  { %v1923_v63 = vadd.f32 %v1922_v59, %v1921_v60  ;;  %v2078_v60 = vld [vmem:[#allocation9] sm:$0xff] }
0x20c1   :  { %v1930_v52 = vpack.c.bf16 %v1923_v63, %v1923_v63  ;;  %v1924_v49 = vmax.f32 %v1923_v63, 0.0 }
0x20c3   :  { %1932 = vrot.lane.b32.xlu0 %v1930_v52, %s2698_s15 }
0x2135   :  { %v1933_v0 = vpop.permute.xlu0 %1932 }
0x2136   :  { %2259 = vmatmul.mubr.msk.bf16.vlgmr.msra.gmra.mrb[40].mxu1 %vm996_vm1, %v1933_v0  ;;  %v2081_v0 = vld [vmem:[#allocation9 + $0x18] sm:$0xff] }
0x2209   :  { %v1971_v1 = vpop.f32.mrb[40].mxu1 }
0x220a   :  { %v1972_v3 = vadd.f32 %v1971_v1, %v3201_v62  ;;  %v1973_v4 = vpop.f32.mrb[41].mxu1 }
0x220b   :  { %v1975_v8 = vpop.f32.mrb[42].mxu1  ;;  %v1974_v19 = vadd.f32 %v1973_v4, %v3207_v10  ;;  %v2083_v4 = vld [vmem:[#allocation9 + $0x28] sm:$0xff] }
0x220c   :  { %v1978_v61 = vadd.f32 %v1972_v3, %v3204_v2  ;;  %v1976_v11 = vpop.f32.mrb[43].mxu1  ;;  %v1132_v3 = vmax.f32 %v3235_v54, 0.0  ;;  %v1276_v8 = vmax.f32 %v3277_v46, 0.0  ;;  %v1564_v54 = vmax.f32 %v3361_v40, 0.0 }
0x220d   :  { %v2085_v11 = vld [vmem:[#allocation9 + $0x38] sm:$0xff]  ;;  %v1852_v46 = vmax.f32 %v3444_v44, 0.0 }
0x220e   :  { %v2260_v12 = vmul.f32 -1.442695, %v1978_v61  ;;  %v2084_v61 = vld [vmem:[#allocation9 + $0x30] sm:$0xff] }
0x2210   :  { %2544 = vpow2.f32 %v2260_v12  ;;  %v2426_v12 = vpack.c.bf16 %v2085_v11, %v2084_v61 }
0x221a   :  { %v2545_v13 = vpop.eup %2544 }
0x221b   :  { %v1982_v17 = vadd.f32 1.0, %v2545_v13  ;;  %v1420_v13 = vmax.f32 %v3319_v30, 0.0  ;;  %v743_v30 = vmul.f32 %v3030_v33, %v3030_v33 }
0x221d   :  { %2546 = vrcp.f32 %v1982_v17  ;;  %v1708_v17 = vmax.f32 %v3403_v41, 0.0 }
0x2227   :  { %v2547_v20 = vpop.eup %2546 }
0x2228   :  { %v1985_v21 = vmul.f32 %v2547_v20, %v1974_v19  ;;  %v1988_v28 = vsub.f32 1.0, %v2547_v20  ;;  %v1994_v31 = vmul.f32 %v2547_v20, %v1923_v63  ;;  %v2079_v63 = vld [vmem:[#allocation9 + $0x8] sm:$0xff] }
0x222a   :  { %v1986_v22 = vadd.f32 %v1985_v21, %v3210_v14 }
0x222c   :  { %2548 = vtanh.f32 %v1986_v22 }
0x2236   :  { %v2549_v25 = vpop.eup %2548 }
0x2237   :  { %1990 = vrot.lane.b32.xlu1 %v2549_v25, %s2698_s15 }
0x22a9   :  { %v1991_v29 = vpop.permute.xlu1 %1990 }
0x22aa   :  { %v1993_v32 = vmul.f32 %v1991_v29, %v1988_v28 }
0x22ac   :  { %v3471_v34 = vadd.f32 %v1994_v31, %v1993_v32 }
0x22ae   :  { %v2002_v35 = vpack.c.bf16 %v3471_v34, %v3471_v34  ;;  %v1996_v19 = vmax.f32 %v3471_v34, 0.0 }
0x22b0   :  { %2004 = vrot.lane.b32.xlu0 %v2002_v35, %s2698_s15 }
0x22b4   :  { %1061 = vrot.lane.b32.xlu0 %v1059_v36, %s2698_s15 }
0x22b8   :  { %1206 = vrot.lane.b32.xlu0 %v1204_v39, %s2698_s15 }
0x22bc   :  { %1350 = vrot.lane.b32.xlu0 %v1348_v43, %s2698_s15 }
0x22c0   :  { %1494 = vrot.lane.b32.xlu0 %v1492_v45, %s2698_s15 }
0x22c4   :  { %1638 = vrot.lane.b32.xlu0 %v1636_v47, %s2698_s15 }
0x22c8   :  { %1782 = vrot.lane.b32.xlu0 %v1780_v26, %s2698_s15 }
0x22cc   :  { %1926 = vrot.lane.b32.xlu0 %v1924_v49, %s2698_s15 }
0x2322   :  { %v2005_v15 = vpop.permute.xlu0 %2004 }
0x2323   :  { %2261 = vmatmul.mubr.msk.bf16.vlgmr.msra.gmra.mrb[40].mxu0 %vm996_vm1, %v2005_v15 }
0x2326   :  { %v1062_v9 = vpop.permute.xlu0 %1061 }
0x2327   :  { %1065 = vst.msk [vmem:[#allocation2] sm:$0x3] %vm1064_vm4, %v1062_v9 }
0x232a   :  { %v1207_v6 = vpop.permute.xlu0 %1206 }
0x232b   :  { %1209 = vst.msk [vmem:[#allocation2 + $0x4] sm:$0x3] %vm1064_vm4, %v1207_v6 }
0x232e   :  { %v1351_v5 = vpop.permute.xlu0 %1350 }
0x232f   :  { %1353 = vst.msk [vmem:[#allocation2 + $0x8] sm:$0x3] %vm1064_vm4, %v1351_v5 }
0x2332   :  { %v1495_v50 = vpop.permute.xlu0 %1494 }
0x2333   :  { %1497 = vst.msk [vmem:[#allocation2 + $0xc] sm:$0x3] %vm1064_vm4, %v1495_v50 }
0x2336   :  { %v1639_v7 = vpop.permute.xlu0 %1638 }
0x2337   :  { %1641 = vst.msk [vmem:[#allocation2 + $0x10] sm:$0x3] %vm1064_vm4, %v1639_v7  ;;  %v2263_v7 = vld [vmem:[%s3581_s19] ss:$0 sm:$0xff] }
0x233a   :  { %v1783_v51 = vpop.permute.xlu0 %1782 }
0x233b   :  { %1785 = vst.msk [vmem:[#allocation2 + $0x14] sm:$0x3] %vm1064_vm4, %v1783_v51 }
0x233e   :  { %v1927_v53 = vpop.permute.xlu0 %1926 }
0x233f   :  { %1929 = vst.msk [vmem:[#allocation2 + $0x18] sm:$0x3] %vm1064_vm4, %v1927_v53 }
0x23f6   :  { %v2043_v16 = vpop.f32.mrb[40].mxu0 }
0x23f7   :  { %v2044_v42 = vadd.f32 %v2043_v16, %v3201_v62  ;;  %v2045_v55 = vpop.f32.mrb[41].mxu0  ;;  %v2414_v62 = vpack.c.bf16 %v2079_v63, %v2078_v60 }
0x23f8   :  { %v2047_v18 = vpop.f32.mrb[42].mxu0  ;;  %v2046_v38 = vadd.f32 %v2045_v55, %v3207_v10  ;;  %v2082_v10 = vld [vmem:[#allocation9 + $0x20] sm:$0xff] }
0x23f9   :  { %v2050_v23 = vadd.f32 %v2044_v42, %v3204_v2  ;;  %v2048_v24 = vpop.f32.mrb[43].mxu0  ;;  %2415 = vmatprep.subr.bf16.mxu1 %v2414_v62  ;;  %v2080_v2 = vld [vmem:[#allocation9 + $0x10] sm:$0xff] }
0x23fa   :  { %2417 = vmatpush3.bf16.msra.mxu1 %v2414_v62  ;;  %v2418_v1 = vpack.c.bf16 %v2081_v0, %v2080_v2 }
0x23fb   :  { %v2262_v27 = vmul.f32 -1.442695, %v2050_v23 }
0x23fc   :  { %2419 = vmatprep.subr.bf16.mxu1 %v2418_v1 }
0x23fd   :  { %2550 = vpow2.f32 %v2262_v27 }
0x23fe   :  { %2421 = vmatpush3.bf16.msra.mxu1 %v2418_v1 }
0x2407   :  { %v2551_v56 = vpop.eup %2550 }
0x2408   :  { %v2054_v37 = vadd.f32 1.0, %v2551_v56 }
0x240a   :  { %2552 = vrcp.f32 %v2054_v37 }
0x2414   :  { %v2553_v57 = vpop.eup %2552 }
0x2415   :  { %v2057_v58 = vmul.f32 %v2553_v57, %v2046_v38  ;;  %v2060_v40 = vsub.f32 1.0, %v2553_v57  ;;  %v2066_v21 = vmul.f32 %v2553_v57, %v3471_v34 }
0x2417   :  { %v2058_v59 = vadd.f32 %v2057_v58, %v3210_v14  ;;  %v2422_v14 = vpack.c.bf16 %v2083_v4, %v2082_v10 }
0x2419   :  { %2554 = vtanh.f32 %v2058_v59  ;;  %2423 = vmatprep.subr.bf16.mxu1 %v2422_v14 }
0x241a   :  { %2425 = vmatpush3.bf16.msra.mxu1 %v2422_v14  ;;  %2556 = vlog2.f32 %v3037_v48 }
0x241b   :  { %2427 = vmatprep.subr.bf16.mxu1 %v2426_v12 }
0x241e   :  { %2429 = vmatpush3.bf16.msra.mxu1 %v2426_v12 }
0x2423   :  { %v2555_v52 = vpop.eup %2554 }
0x2424   :  { %2062 = vrot.lane.b32.xlu1 %v2555_v52, %s2698_s15  ;;  %v2557_v34 = vpop.eup %2556 }
0x2425   :  { %v741_v39 = vmul.f32 0.6931472, %v2557_v34 }
0x2427   :  { %v742_v45 = vadd.f32 1.0, %v741_v39 }
0x2428   :  { %1134 = vrot.lane.b32.xlu1 %v1132_v3, %s2698_s15 }
0x242c   :  { %1278 = vrot.lane.b32.xlu1 %v1276_v8, %s2698_s15 }
0x2430   :  { %1422 = vrot.lane.b32.xlu1 %v1420_v13, %s2698_s15 }
0x2434   :  { %1566 = vrot.lane.b32.xlu1 %v1564_v54, %s2698_s15 }
0x2438   :  { %1710 = vrot.lane.b32.xlu1 %v1708_v17, %s2698_s15 }
0x243c   :  { %1854 = vrot.lane.b32.xlu1 %v1852_v46, %s2698_s15 }
0x2440   :  { %1998 = vrot.lane.b32.xlu1 %v1996_v19, %s2698_s15 }
0x2444   :  { %745 = vrot.lane.b32.xlu1 %v743_v30, %s2699_s17 }
0x2496   :  { %v2063_v20 = vpop.permute.xlu1 %2062 }
0x2497   :  { %v2065_v41 = vmul.f32 %v2063_v20, %v2060_v40 }
0x2499   :  { %v2067_v22 = vadd.f32 %v2066_v21, %v2065_v41 }
0x249a   :  { %v1135_v25 = vpop.permute.xlu1 %1134 }
0x249b   :  { %v2068_v28 = vmax.f32 %v2067_v22, 0.0  ;;  %1137 = vst.msk [vmem:[#allocation2 + $0x2] sm:$0x3] %vm1064_vm4, %v1135_v25 }
0x249d   :  { %2070 = vrot.lane.b32.xlu0 %v2068_v28, %s2698_s15 }
0x249e   :  { %v1279_v44 = vpop.permute.xlu1 %1278 }
0x249f   :  { %1281 = vst.msk [vmem:[#allocation2 + $0x6] sm:$0x3] %vm1064_vm4, %v1279_v44 }
0x24a2   :  { %v1423_v29 = vpop.permute.xlu1 %1422 }
0x24a3   :  { %1425 = vst.msk [vmem:[#allocation2 + $0xa] sm:$0x3] %vm1064_vm4, %v1423_v29 }
0x24a6   :  { %v1567_v33 = vpop.permute.xlu1 %1566  ;;  %v2074_v31 = vld [vmem:[#allocation2] sm:$0xff] }
0x24a7   :  { %1569 = vst.msk [vmem:[#allocation2 + $0xe] sm:$0x3] %vm1064_vm4, %v1567_v33  ;;  %2390 = vmatprep.mubr.msk.f32.mxu1 %vm996_vm1, %v2074_v31 }
0x24aa   :  { %v1711_v32 = vpop.permute.xlu1 %1710 }
0x24ab   :  { %1713 = vst.msk [vmem:[#allocation2 + $0x12] sm:$0x3] %vm1064_vm4, %v1711_v32 }
0x24ae   :  { %v1855_v35 = vpop.permute.xlu1 %1854  ;;  %v2075_v36 = vld [vmem:[#allocation2 + $0x8] sm:$0xff] }
0x24af   :  { %1857 = vst.msk [vmem:[#allocation2 + $0x16] sm:$0x3] %vm1064_vm4, %v1855_v35  ;;  %2391 = vmatmul.mubr.msk.f32.vlgmr.msra.gmra.mrb[10].mxu1 %vm996_vm1, %v2075_v36 }
0x24b2   :  { %v1999_v43 = vpop.permute.xlu1 %1998 }
0x24b3   :  { %2001 = vst.msk [vmem:[#allocation2 + $0x1a] sm:$0x3] %vm1064_vm4, %v1999_v43 }
0x24b6   :  { %v746_v47 = vpop.permute.xlu1 %745  ;;  %v2076_v26 = vld [vmem:[#allocation2 + $0x10] sm:$0xff] }
0x24b7   :  { %v748_v49 = vsub.f32 %v742_v45, %v746_v47  ;;  %2393 = vmatprep.mubr.msk.f32.mxu1 %vm996_vm1, %v2076_v26 }
0x24b9   :  { %v749_v15 = vsub.f32 %v748_v49, %v3037_v48 }
0x24bb   :  { %751 = vrot.lane.b32.xlu0 %v749_v15, %s2696_s8 }
0x250f   :  { %v2071_v9 = vpop.permute.xlu0 %2070 }
0x2510   :  { %2073 = vst.msk [vmem:[#allocation2 + $0x1c] sm:$0x3] %vm1064_vm4, %v2071_v9 }
0x2517   :  { %v2077_v6 = vld [vmem:[#allocation2 + $0x18] sm:$0x3f] }
0x2518   :  { %2394 = vmatmul.mubr.msk.f32.gmra.mrb[44].mxu1 %vm996_vm1, %v2077_v6 }
0x252d   :  { %v752_v5 = vpop.permute.xlu0 %751 }
0x252e   :  { %v755_v50 = vsel %vm754_vm0, %v752_v5, 0.0 }
0x252f   :  { %756 = vadd.xlane.f32.xlu1 %v755_v50 }
0x2582   :  { %v2392_v51 = vpop.f32.mrb[10].mxu1 }
0x2583   :  { %v2177_v53 = vadd.f32 %v2392_v51, %v2263_v7  ;;  %v2171_v16 = vpop.f32.mrb[11].mxu1 }
0x2584   :  { %v2172_v48 = vadd.f32 %v2263_v7, %v2171_v16 }
0x2585   :  { %2191 = vst [vmem:[%s3582_s20 + $0x8] sm:$0xff] %v2177_v53 }
0x2586   :  { %2190 = vst [vmem:[%s3582_s20] sm:$0xff] %v2172_v48 }
0x25bc   :  { %v757_v42 = vpop.xlane.xlu1 %756 }
0x25bd   :  { %v758_v55 = vrot.slane %v757_v42, 4 }
0x25bf   :  { %v759_v18 = vadd.f32 %v758_v55, %v757_v42 }
0x25c1   :  { %v760_v23 = vrot.slane %v759_v18, 2 }
0x25c3   :  { %v761_v24 = vadd.f32 %v760_v23, %v759_v18 }
0x25c5   :  { %v762_v27 = vrot.slane %v761_v24, 1 }
0x25c7   :  { %v763_v56 = vadd.f32 %v762_v27, %v761_v24 }
0x25c9   :  { %2433 = vpush %v763_v56 }
0x25eb   :  { %v2395_v37 = vpop.f32.mrb[44].mxu1 }
0x25ec   :  { %v2187_v38 = vadd.f32 %v2395_v37, %v2263_v7  ;;  %v2181_v57 = vpop.f32.mrb[45].mxu1 }
0x25ed   :  { %v2182_v58 = vadd.f32 %v2263_v7, %v2181_v57 }
0x25ee   :  { %2193 = vst [vmem:[%s3582_s20 + $0x18] sm:$0x3f] %v2187_v38 }
0x25ef   :  { %2192 = vst [vmem:[%s3582_s20 + $0x10] sm:$0xff] %v2182_v58 }
0x25fa   :  { %s2434_s30 = spop %2433 }
0x25fb   :  { %v765_v59 = vstv %s2434_s30 }
0x25fc   :  { %v766_v60 = vmul.f32 -0.5, %v765_v59 }
0x25fe   :  { %768 = vst.msk [vmem:[#allocation11] sm:$0x1] %vm767_vm5, %v766_v60 }
0x25ff   :  { %2657 = shalt.err (!%p2654_p8)
}
0x2600   :  { %s2658_s20 = scalar_lea.hbm %s3583_s21, 16 }
0x2601   :  { %p2659_p9 = scmp.ne.s32.totalorder %s3583_s21, %s2658_s20  ;;  %p2662_p10 = scmp.lt.u32.totalorder %s2658_s20, %s3583_s21 }
0x2603   :  { %p2664_p11 = pnand %p2662_p10, %p2659_p9 }
0x2605   :  { %2667 = shalt.err (!%p2664_p11)
}
0x2606   :  { %2205 = dma.vmem_to_hbm [thread:$0]  %s2203_s24, 16, %s3583_s21, [#allocation5]  }
0x2607   :  { %2674 = dma.done.wait [#allocation5], 16  }
0x2608   :  { %2675 = vsyncadd [#allocation5], 4294967280 }
0x2609   :  { %2211 = vsyncpa [#allocation4], 1 }
0x260a   :  { %2212 = vsyncpa [#allocation7], 1 }
0x260b   :  { %2213 = vsyncpa [#allocation10], 1 }
0x260c   :  { %2214 = vsyncpa [#allocation5], 1 }

</bundles_post_ra>
